<compile_context>
chip_gen: v6e
topology: v6e:2x2x1
jax: 0.10.0
libtpu: 0.0.40
codegen_flags: <defaults>
</compile_context>

<pallas_src>
import math
import jax
import jax.numpy as jnp
from jax import lax
from jax.experimental import pallas as pl
from jax.experimental.pallas import tpu as pltpu


def _rvq_kernel(x_ref, emb_ref, hsq_ref, q_out_ref, codes_ref):
    """Residual VQ over all n_q codebooks for one [D, tn] tile of tokens.

    x_ref:     [1, D, TN]    f32  tile of tokens (tokens on lanes)
    emb_ref:   [n_q, Q, D]   f32  codebooks, resident in VMEM
    hsq_ref:   [n_q, Q, 1]   f32  0.5 * ||e||^2 per code (Q on sublanes)
    q_out_ref: [1, D, TN]    f32  sum of per-layer quantized vectors
    codes_ref: [1, n_q, TN]  i32  lane-dense code indices
    """
    n_q, Q, _ = emb_ref.shape
    tn = x_ref.shape[-1]

    x = x_ref[0].astype(jnp.float32)                              # [D, tn]
    residual = x

    # Hoisted once: row-id iota used for first-match argmin + one-hot decode.
    row_iota = lax.broadcasted_iota(jnp.int32, (Q, tn), 0)        # [Q, tn]

    code_rows = []
    for k in range(n_q):                                          # static unroll (small n_q)
        e = emb_ref[k].astype(jnp.float32)                        # [Q, D]
        hsq = hsq_ref[k]                                          # [Q, 1]

        # argmin_q (0.5*||e_q||^2 - e_q . r)  ==  argmin_q ||r - e_q||^2
        dots = lax.dot_general(e, residual, (((1,), (0,)), ((), ())),
                               preferred_element_type=jnp.float32)       # [Q, tn] (MXU)
        dists = hsq - dots                                               # [Q, tn]

        # First-match argmin along sublanes (two min reductions; matches
        # torch.argmin tie-breaking) -> lane-dense [1, tn] code row.
        min_d = jnp.min(dists, axis=0, keepdims=True)                    # [1, tn]
        codes_row = jnp.min(jnp.where(dists <= min_d, row_iota, Q),
                            axis=0, keepdims=True)                       # [1, tn] i32

        # Gather-free decode: exact row-select via one-hot on the MXU.
        one_hot = (row_iota == codes_row).astype(jnp.float32)            # [Q, tn]
        q = lax.dot_general(e, one_hot, (((0,), (0,)), ((), ())),
                            preferred_element_type=jnp.float32)          # [D, tn]
        residual = residual - q
        code_rows.append(codes_row)

    # quantized_out == x - final residual (drops a live [D, tn] accumulator).
    q_out_ref[0, :, :] = (x - residual).astype(q_out_ref.dtype)
    codes_ref[0, :, :] = jnp.concatenate(code_rows, axis=0)              # one store


def _pick_tile_t(B, T, target=512):
    """Tile along T: lane-dense (multiple of 128) or the full T; prefer a
    divisor of T (no padding) and >= 2 total grid steps (v7x has 2 TCs)."""
    if T <= target:
        return T
    if B == 1:
        # single-batch: cap so the grid still has >= 2 steps for megacore
        target = max(128, min(target, (T // 2) // 128 * 128))
    for cand in range(target, 127, -128):
        if T % cand == 0:
            return cand
    return target  # no 128-multiple divides T: pad


def _vmem_cap_bytes():
    """~75% of physical VMEM (≈96 MiB v5e/v6e, ≈48 MiB v7x), safe fallback."""
    try:
        cap = int(pltpu.get_tpu_info().vmem_capacity_bytes)
    except Exception:
        cap = 64 << 20
    return min(int(cap * 0.75), 100 << 20)


def rvq_forward(x, embeddings, frame_rate, *, tile_t=None):
    """Eval-mode forward of ResidualVectorQuantizer.

    x:          [B, D, T]   float32
    embeddings: [n_q, Q, D] float32 (codebooks == embedding_sum / cluster_usage)
    Returns (quantized [B, D, T], codes [B, n_q, T] int32, bandwidth scalar,
             penalty scalar, metrics dict).
    """
    B, D, T = x.shape
    n_q, Q, Dc = embeddings.shape
    assert Dc == D

    tn = tile_t if tile_t is not None else _pick_tile_t(B, T)
    assert tn == T or tn % 128 == 0, "time tile must be lane-dense or the full T"
    t_pad = pl.cdiv(T, tn) * tn
    x_in = x if t_pad == T else jnp.pad(x, ((0, 0), (0, 0), (0, t_pad - T)))

    # Hoist 0.5*||e||^2 out of the kernel; [n_q, Q, 1] so Q sits on sublanes.
    half_e_sq = (0.5 * jnp.sum(embeddings.astype(jnp.float32) ** 2, axis=-1))[..., None]

    # VMEM budget estimate (layout-padded f32 words) with headroom, capped per generation.
    def _rs(v):  # sublane (second-last dim) padding
        return -(-v // 8) * 8

    def _rl(v):  # lane (last dim) padding
        return -(-v // 128) * 128

    est_bytes = 4 * (
        2 * _rs(D) * _rl(tn)            # x blocks (double-buffered)
        + 2 * _rs(D) * _rl(tn)          # q_out blocks
        + 2 * _rs(n_q) * _rl(tn)        # codes blocks
        + 2 * n_q * _rs(Q) * _rl(D)     # resident codebooks (conservative x2)
        + 2 * n_q * _rs(Q) * _rl(1)     # 0.5*||e||^2
        + 6 * _rs(Q) * _rl(tn)          # dists / one-hot live intermediates
        + 4 * _rs(D) * _rl(tn)          # x / residual / q live values
    )
    vmem_limit = int(min(max(2 * est_bytes, 8 << 20), _vmem_cap_bytes()))

    q_pad, codes_pad = pl.pallas_call(
        _rvq_kernel,
        out_shape=(
            jax.ShapeDtypeStruct((B, D, t_pad), x.dtype),
            jax.ShapeDtypeStruct((B, n_q, t_pad), jnp.int32),   # PyTorch emits int64; int32 here
        ),
        grid_spec=pltpu.PrefetchScalarGridSpec(
            num_scalar_prefetch=0,
            grid=(B, t_pad // tn),
            in_specs=[
                pl.BlockSpec((1, D, tn), lambda b, t: (b, 0, t)),      # token tile (tokens on lanes)
                pl.BlockSpec((n_q, Q, D), lambda b, t: (0, 0, 0)),     # codebooks, VMEM-resident
                pl.BlockSpec((n_q, Q, 1), lambda b, t: (0, 0, 0)),     # 0.5*||e||^2, resident
            ],
            out_specs=[
                pl.BlockSpec((1, D, tn), lambda b, t: (b, 0, t)),      # quantized sum
                pl.BlockSpec((1, n_q, tn), lambda b, t: (b, 0, t)),    # lane-dense codes
            ],
        ),
        compiler_params=pltpu.CompilerParams(
            dimension_semantics=("parallel", "parallel"),              # shard tiles across TCs
            vmem_limit_bytes=vmem_limit,
        ),
    )(x_in, embeddings, half_e_sq)

    quantized = q_pad[:, :, :T]                 # [B, D, T]
    codes = codes_pad[:, :, :T]                 # [B, n_q, T]

    bw = jnp.asarray(n_q * math.log2(Q) * frame_rate / 1000.0, dtype=x.dtype)
    commit_losses = jnp.zeros((n_q,), dtype=x.dtype)    # eval mode: zero_scalar per layer
    penalty = jnp.mean(commit_losses)
    return quantized, codes, bw, penalty, {}


def _rvq_reference(x, embeddings):
    """Pure-JAX reference of the same residual-VQ chain (eval mode)."""
    B, D, T = x.shape
    n_q, Q, _ = embeddings.shape
    xs = jnp.transpose(x, (0, 2, 1)).reshape(B * T, D)
    residual = xs
    quant_out = jnp.zeros_like(xs)
    codes = []
    for k in range(n_q):
        e = embeddings[k]
        dists = jnp.sum(e * e, axis=-1)[None, :] - 2.0 * residual @ e.T
        c = jnp.argmin(dists, axis=-1)
        q = e[c]
        residual = residual - q
        quant_out = quant_out + q
        codes.append(c.astype(jnp.int32))
    quantized = jnp.transpose(quant_out.reshape(B, T, D), (0, 2, 1))
    codes = jnp.transpose(jnp.stack(codes, axis=0).reshape(n_q, B, T), (1, 0, 2))
    return quantized, codes


if __name__ == "__main__":
    # Module-consistent small shapes: dimension=32, bins=64, n_q=4, B=2, T=128
    # (tile tn = T = 128, grid = (2, 1) -> two steps for megacore sharding).
    B, D, T = 2, 32, 128
    n_q, bins = 4, 64
    frame_rate = 50

    key = jax.random.PRNGKey(0)
    kx, ke = jax.random.split(key)
    x = jax.random.normal(kx, (B, D, T), dtype=jnp.float32)

    # Deterministic synthetic codebooks: cluster_usage = ones, embedding_sum ~ N(0,1)
    # => embedding = embedding_sum / clamp(cluster_usage, eps) = embedding_sum.
    embeddings = jax.random.normal(ke, (n_q, bins, D), dtype=jnp.float32)

    quantized, codes, bw, penalty, metrics = rvq_forward(x, embeddings, frame_rate)
    jax.block_until_ready((quantized, codes, bw, penalty))

    ref_q, ref_c = _rvq_reference(x, embeddings)
    assert quantized.shape == (B, D, T)
    assert codes.shape == (B, n_q, T)
    assert jnp.allclose(quantized, ref_q, atol=1e-4, rtol=1e-4), "quantized mismatch"
    assert jnp.array_equal(codes, ref_c), "codes mismatch"
    assert float(penalty) == 0.0

    print("KERNEL_OK")
</pallas_src>

<mosaic_0001>
module attributes {stable_mosaic.version = 11 : i64} {
  func.func @_rvq_kernel(%arg0: i32, %arg1: i32, %arg2: memref<1x32x128xf32, #tpu.memory_space<vmem>>, %arg3: memref<4x64x32xf32, #tpu.memory_space<vmem>>, %arg4: memref<4x64x1xf32, #tpu.memory_space<vmem>>, %arg5: memref<1x32x128xf32, #tpu.memory_space<vmem>>, %arg6: memref<1x4x128xi32, #tpu.memory_space<vmem>>) attributes {dimension_semantics = [#tpu.dimension_semantics<parallel>, #tpu.dimension_semantics<parallel>], iteration_bounds = array<i64: 2, 1>, scalar_prefetch = 0 : i64, scratch_operands = 0 : i64, tpu.core_type = #tpu.core_type<tc>, window_params = [{transform_indices = @transform_0, window_bounds = array<i64: 1, 32, 128>}, {pipeline_mode = #tpu.pipeline_mode<synchronous>, transform_indices = @transform_1, window_bounds = array<i64: 4, 64, 32>}, {pipeline_mode = #tpu.pipeline_mode<synchronous>, transform_indices = @transform_2, window_bounds = array<i64: 4, 64, 1>}, {transform_indices = @transform_3, window_bounds = array<i64: 1, 32, 128>}, {transform_indices = @transform_4, window_bounds = array<i64: 1, 4, 128>}]} {
    %c0 = arith.constant 0 : index
    %c0_0 = arith.constant 0 : index
    %c0_1 = arith.constant 0 : index
    %0 = vector.load %arg2[%c0, %c0_0, %c0_1] : memref<1x32x128xf32, #tpu.memory_space<vmem>>, vector<1x32x128xf32>
    %1 = vector.shape_cast %0 : vector<1x32x128xf32> to vector<32x128xf32>
    %2 = tpu.iota {dimensions = array<i32: 0>} : vector<64x128xi32>
    %c0_2 = arith.constant 0 : index
    %c0_3 = arith.constant 0 : index
    %c0_4 = arith.constant 0 : index
    %3 = vector.load %arg3[%c0_2, %c0_3, %c0_4] : memref<4x64x32xf32, #tpu.memory_space<vmem>>, vector<1x64x32xf32>
    %4 = vector.shape_cast %3 : vector<1x64x32xf32> to vector<64x32xf32>
    %c0_5 = arith.constant 0 : index
    %c0_6 = arith.constant 0 : index
    %c0_7 = arith.constant 0 : index
    %5 = vector.load %arg4[%c0_5, %c0_6, %c0_7] : memref<4x64x1xf32, #tpu.memory_space<vmem>>, vector<1x64x1xf32>
    %6 = vector.shape_cast %5 : vector<1x64x1xf32> to vector<64x1xf32>
    %cst = arith.constant dense<0.000000e+00> : vector<64x128xf32>
    %7 = tpu.matmul %4, %1, %cst {dimension_numbers = #tpu.dot_dimension_numbers<[1], [0], [0], [1], [0, 0, 1, 1], [], []>} : vector<64x32xf32>, vector<32x128xf32>, vector<64x128xf32> -> vector<64x128xf32>
    %8 = vector.broadcast %6 : vector<64x1xf32> to vector<64x128xf32>
    %9 = arith.subf %8, %7 : vector<64x128xf32>
    %cst_8 = arith.constant dense<0x7F800000> : vector<128xf32>
    %10 = vector.multi_reduction <minimumf>, %9, %cst_8 [0] : vector<64x128xf32> to vector<128xf32>
    %11 = vector.shape_cast %10 : vector<128xf32> to vector<1x128xf32>
    %12 = vector.broadcast %11 : vector<1x128xf32> to vector<64x128xf32>
    %13 = arith.cmpf ole, %9, %12 : vector<64x128xf32>
    %c64_i32 = arith.constant 64 : i32
    %14 = vector.broadcast %c64_i32 : i32 to vector<64x128xi32>
    %15 = arith.select %13, %2, %14 : vector<64x128xi1>, vector<64x128xi32>
    %cst_9 = arith.constant dense<2147483647> : vector<128xi32>
    %16 = vector.multi_reduction <minsi>, %15, %cst_9 [0] : vector<64x128xi32> to vector<128xi32>
    %17 = vector.shape_cast %16 : vector<128xi32> to vector<1x128xi32>
    %18 = vector.broadcast %17 : vector<1x128xi32> to vector<64x128xi32>
    %19 = arith.cmpi eq, %2, %18 : vector<64x128xi32>
    %20 = arith.extui %19 : vector<64x128xi1> to vector<64x128xi32>
    %21 = arith.sitofp %20 : vector<64x128xi32> to vector<64x128xf32>
    %cst_10 = arith.constant dense<0.000000e+00> : vector<32x128xf32>
    %22 = tpu.matmul %4, %21, %cst_10 {dimension_numbers = #tpu.dot_dimension_numbers<[0], [0], [1], [1], [0, 1, 1, 1], [], []>} : vector<64x32xf32>, vector<64x128xf32>, vector<32x128xf32> -> vector<32x128xf32>
    %23 = arith.subf %1, %22 : vector<32x128xf32>
    %c1 = arith.constant 1 : index
    %c0_11 = arith.constant 0 : index
    %c0_12 = arith.constant 0 : index
    %24 = vector.load %arg3[%c1, %c0_11, %c0_12] : memref<4x64x32xf32, #tpu.memory_space<vmem>>, vector<1x64x32xf32>
    %25 = vector.shape_cast %24 : vector<1x64x32xf32> to vector<64x32xf32>
    %c1_13 = arith.constant 1 : index
    %c0_14 = arith.constant 0 : index
    %c0_15 = arith.constant 0 : index
    %26 = vector.load %arg4[%c1_13, %c0_14, %c0_15] : memref<4x64x1xf32, #tpu.memory_space<vmem>>, vector<1x64x1xf32>
    %27 = vector.shape_cast %26 : vector<1x64x1xf32> to vector<64x1xf32>
    %cst_16 = arith.constant dense<0.000000e+00> : vector<64x128xf32>
    %28 = tpu.matmul %25, %23, %cst_16 {dimension_numbers = #tpu.dot_dimension_numbers<[1], [0], [0], [1], [0, 0, 1, 1], [], []>} : vector<64x32xf32>, vector<32x128xf32>, vector<64x128xf32> -> vector<64x128xf32>
    %29 = vector.broadcast %27 : vector<64x1xf32> to vector<64x128xf32>
    %30 = arith.subf %29, %28 : vector<64x128xf32>
    %cst_17 = arith.constant dense<0x7F800000> : vector<128xf32>
    %31 = vector.multi_reduction <minimumf>, %30, %cst_17 [0] : vector<64x128xf32> to vector<128xf32>
    %32 = vector.shape_cast %31 : vector<128xf32> to vector<1x128xf32>
    %33 = vector.broadcast %32 : vector<1x128xf32> to vector<64x128xf32>
    %34 = arith.cmpf ole, %30, %33 : vector<64x128xf32>
    %c64_i32_18 = arith.constant 64 : i32
    %35 = vector.broadcast %c64_i32_18 : i32 to vector<64x128xi32>
    %36 = arith.select %34, %2, %35 : vector<64x128xi1>, vector<64x128xi32>
    %cst_19 = arith.constant dense<2147483647> : vector<128xi32>
    %37 = vector.multi_reduction <minsi>, %36, %cst_19 [0] : vector<64x128xi32> to vector<128xi32>
    %38 = vector.shape_cast %37 : vector<128xi32> to vector<1x128xi32>
    %39 = vector.broadcast %38 : vector<1x128xi32> to vector<64x128xi32>
    %40 = arith.cmpi eq, %2, %39 : vector<64x128xi32>
    %41 = arith.extui %40 : vector<64x128xi1> to vector<64x128xi32>
    %42 = arith.sitofp %41 : vector<64x128xi32> to vector<64x128xf32>
    %cst_20 = arith.constant dense<0.000000e+00> : vector<32x128xf32>
    %43 = tpu.matmul %25, %42, %cst_20 {dimension_numbers = #tpu.dot_dimension_numbers<[0], [0], [1], [1], [0, 1, 1, 1], [], []>} : vector<64x32xf32>, vector<64x128xf32>, vector<32x128xf32> -> vector<32x128xf32>
    %44 = arith.subf %23, %43 : vector<32x128xf32>
    %c2 = arith.constant 2 : index
    %c0_21 = arith.constant 0 : index
    %c0_22 = arith.constant 0 : index
    %45 = vector.load %arg3[%c2, %c0_21, %c0_22] : memref<4x64x32xf32, #tpu.memory_space<vmem>>, vector<1x64x32xf32>
    %46 = vector.shape_cast %45 : vector<1x64x32xf32> to vector<64x32xf32>
    %c2_23 = arith.constant 2 : index
    %c0_24 = arith.constant 0 : index
    %c0_25 = arith.constant 0 : index
    %47 = vector.load %arg4[%c2_23, %c0_24, %c0_25] : memref<4x64x1xf32, #tpu.memory_space<vmem>>, vector<1x64x1xf32>
    %48 = vector.shape_cast %47 : vector<1x64x1xf32> to vector<64x1xf32>
    %cst_26 = arith.constant dense<0.000000e+00> : vector<64x128xf32>
    %49 = tpu.matmul %46, %44, %cst_26 {dimension_numbers = #tpu.dot_dimension_numbers<[1], [0], [0], [1], [0, 0, 1, 1], [], []>} : vector<64x32xf32>, vector<32x128xf32>, vector<64x128xf32> -> vector<64x128xf32>
    %50 = vector.broadcast %48 : vector<64x1xf32> to vector<64x128xf32>
    %51 = arith.subf %50, %49 : vector<64x128xf32>
    %cst_27 = arith.constant dense<0x7F800000> : vector<128xf32>
    %52 = vector.multi_reduction <minimumf>, %51, %cst_27 [0] : vector<64x128xf32> to vector<128xf32>
    %53 = vector.shape_cast %52 : vector<128xf32> to vector<1x128xf32>
    %54 = vector.broadcast %53 : vector<1x128xf32> to vector<64x128xf32>
    %55 = arith.cmpf ole, %51, %54 : vector<64x128xf32>
    %c64_i32_28 = arith.constant 64 : i32
    %56 = vector.broadcast %c64_i32_28 : i32 to vector<64x128xi32>
    %57 = arith.select %55, %2, %56 : vector<64x128xi1>, vector<64x128xi32>
    %cst_29 = arith.constant dense<2147483647> : vector<128xi32>
    %58 = vector.multi_reduction <minsi>, %57, %cst_29 [0] : vector<64x128xi32> to vector<128xi32>
    %59 = vector.shape_cast %58 : vector<128xi32> to vector<1x128xi32>
    %60 = vector.broadcast %59 : vector<1x128xi32> to vector<64x128xi32>
    %61 = arith.cmpi eq, %2, %60 : vector<64x128xi32>
    %62 = arith.extui %61 : vector<64x128xi1> to vector<64x128xi32>
    %63 = arith.sitofp %62 : vector<64x128xi32> to vector<64x128xf32>
    %cst_30 = arith.constant dense<0.000000e+00> : vector<32x128xf32>
    %64 = tpu.matmul %46, %63, %cst_30 {dimension_numbers = #tpu.dot_dimension_numbers<[0], [0], [1], [1], [0, 1, 1, 1], [], []>} : vector<64x32xf32>, vector<64x128xf32>, vector<32x128xf32> -> vector<32x128xf32>
    %65 = arith.subf %44, %64 : vector<32x128xf32>
    %c3 = arith.constant 3 : index
    %c0_31 = arith.constant 0 : index
    %c0_32 = arith.constant 0 : index
    %66 = vector.load %arg3[%c3, %c0_31, %c0_32] : memref<4x64x32xf32, #tpu.memory_space<vmem>>, vector<1x64x32xf32>
    %67 = vector.shape_cast %66 : vector<1x64x32xf32> to vector<64x32xf32>
    %c3_33 = arith.constant 3 : index
    %c0_34 = arith.constant 0 : index
    %c0_35 = arith.constant 0 : index
    %68 = vector.load %arg4[%c3_33, %c0_34, %c0_35] : memref<4x64x1xf32, #tpu.memory_space<vmem>>, vector<1x64x1xf32>
    %69 = vector.shape_cast %68 : vector<1x64x1xf32> to vector<64x1xf32>
    %cst_36 = arith.constant dense<0.000000e+00> : vector<64x128xf32>
    %70 = tpu.matmul %67, %65, %cst_36 {dimension_numbers = #tpu.dot_dimension_numbers<[1], [0], [0], [1], [0, 0, 1, 1], [], []>} : vector<64x32xf32>, vector<32x128xf32>, vector<64x128xf32> -> vector<64x128xf32>
    %71 = vector.broadcast %69 : vector<64x1xf32> to vector<64x128xf32>
    %72 = arith.subf %71, %70 : vector<64x128xf32>
    %cst_37 = arith.constant dense<0x7F800000> : vector<128xf32>
    %73 = vector.multi_reduction <minimumf>, %72, %cst_37 [0] : vector<64x128xf32> to vector<128xf32>
    %74 = vector.shape_cast %73 : vector<128xf32> to vector<1x128xf32>
    %75 = vector.broadcast %74 : vector<1x128xf32> to vector<64x128xf32>
    %76 = arith.cmpf ole, %72, %75 : vector<64x128xf32>
    %c64_i32_38 = arith.constant 64 : i32
    %77 = vector.broadcast %c64_i32_38 : i32 to vector<64x128xi32>
    %78 = arith.select %76, %2, %77 : vector<64x128xi1>, vector<64x128xi32>
    %cst_39 = arith.constant dense<2147483647> : vector<128xi32>
    %79 = vector.multi_reduction <minsi>, %78, %cst_39 [0] : vector<64x128xi32> to vector<128xi32>
    %80 = vector.shape_cast %79 : vector<128xi32> to vector<1x128xi32>
    %81 = vector.broadcast %80 : vector<1x128xi32> to vector<64x128xi32>
    %82 = arith.cmpi eq, %2, %81 : vector<64x128xi32>
    %83 = arith.extui %82 : vector<64x128xi1> to vector<64x128xi32>
    %84 = arith.sitofp %83 : vector<64x128xi32> to vector<64x128xf32>
    %cst_40 = arith.constant dense<0.000000e+00> : vector<32x128xf32>
    %85 = tpu.matmul %67, %84, %cst_40 {dimension_numbers = #tpu.dot_dimension_numbers<[0], [0], [1], [1], [0, 1, 1, 1], [], []>} : vector<64x32xf32>, vector<64x128xf32>, vector<32x128xf32> -> vector<32x128xf32>
    %86 = arith.subf %65, %85 : vector<32x128xf32>
    %87 = arith.subf %1, %86 : vector<32x128xf32>
    %c0_41 = arith.constant 0 : index
    %c0_42 = arith.constant 0 : index
    %c0_43 = arith.constant 0 : index
    %88 = vector.load %arg5[%c0_41, %c0_42, %c0_43] : memref<1x32x128xf32, #tpu.memory_space<vmem>>, vector<1x32x128xf32>
    %89 = vector.shape_cast %88 : vector<1x32x128xf32> to vector<32x128xf32>
    %90 = vector.shape_cast %87 : vector<32x128xf32> to vector<1x32x128xf32>
    tpu.vector_store %arg5[%c0_41, %c0_42, %c0_43], %90 {strides = array<i32>} : memref<1x32x128xf32, #tpu.memory_space<vmem>>, vector<1x32x128xf32>,
    %91 = tpu.concatenate %17, %38, %59, %80 in 0 : vector<1x128xi32>, vector<1x128xi32>, vector<1x128xi32>, vector<1x128xi32> -> vector<4x128xi32>
    %c0_44 = arith.constant 0 : index
    %c0_45 = arith.constant 0 : index
    %c0_46 = arith.constant 0 : index
    %92 = vector.load %arg6[%c0_44, %c0_45, %c0_46] : memref<1x4x128xi32, #tpu.memory_space<vmem>>, vector<1x4x128xi32>
    %93 = vector.shape_cast %92 : vector<1x4x128xi32> to vector<4x128xi32>
    %94 = vector.shape_cast %91 : vector<4x128xi32> to vector<1x4x128xi32>
    tpu.vector_store %arg6[%c0_44, %c0_45, %c0_46], %94 {strides = array<i32>} : memref<1x4x128xi32, #tpu.memory_space<vmem>>, vector<1x4x128xi32>,
    return
  }
  func.func @transform_0(%arg0: i32, %arg1: i32) -> (i32, i32, i32) {
    %c0_i32 = arith.constant 0 : i32
    %c0_i32_0 = arith.constant 0 : i32
    return %arg0, %c0_i32, %arg1 : i32, i32, i32
  }
  func.func @transform_1(%arg0: i32, %arg1: i32) -> (i32, i32, i32) {
    %c0_i32 = arith.constant 0 : i32
    %c0_i32_0 = arith.constant 0 : i32
    %c0_i32_1 = arith.constant 0 : i32
    %c0_i32_2 = arith.constant 0 : i32
    return %c0_i32, %c0_i32_0, %c0_i32_1 : i32, i32, i32
  }
  func.func @transform_2(%arg0: i32, %arg1: i32) -> (i32, i32, i32) {
    %c0_i32 = arith.constant 0 : i32
    %c0_i32_0 = arith.constant 0 : i32
    %c0_i32_1 = arith.constant 0 : i32
    %c0_i32_2 = arith.constant 0 : i32
    return %c0_i32, %c0_i32_0, %c0_i32_1 : i32, i32, i32
  }
  func.func @transform_3(%arg0: i32, %arg1: i32) -> (i32, i32, i32) {
    %c0_i32 = arith.constant 0 : i32
    %c0_i32_0 = arith.constant 0 : i32
    return %arg0, %c0_i32, %arg1 : i32, i32, i32
  }
  func.func @transform_4(%arg0: i32, %arg1: i32) -> (i32, i32, i32) {
    %c0_i32 = arith.constant 0 : i32
    %c0_i32_0 = arith.constant 0 : i32
    return %arg0, %c0_i32, %arg1 : i32, i32, i32
  }
}

</mosaic_0001>

<bundles_post_ra>
// kernel: tpu_custom_call.1
= control target key start
LH: loop header
LB: loop body
LE: loop exit
PB: predicated region body
PF: predicated region fallthrough
CT: control target
= control target key end

     0   :  { %10 = vsyncpa [#allocation3], 0  ;;  %s3363_s0 = inlined_call_operand.vmem [shape: f32[2,32,128], index: 0, kind: input, shape index: {}]   ;;  %s3364_s1 = inlined_call_operand.vmem [shape: f32[4,64,32], index: 1, kind: input, shape index: {}]   ;;  %s3365_s2 = inlined_call_operand.vmem [shape: f32[4,64,1], index: 2, kind: input, shape index: {}]   ;;  %s3366_s3 = inlined_call_operand.hbm [shape: f32[2,32,128], index: 3, kind: output, shape index: {0}]   ;;  %s3367_s4 = inlined_call_operand.hbm [shape: s32[2,4,128], index: 4, kind: output, shape index: {1}]  }
   0x1   :  { %12 = vsyncpa [#allocation3 + $0x1], 0 }
   0x2   :  { %13 = vsyncpa [#allocation5], 0 }
   0x3   :  { %15 = vsyncpa [#allocation5 + $0x1], 0  ;;  %s2675_s15 = smov 0   ;;  %s2677_s16 = smov 0  }
   0x4   :  { %s2679_s17 = smov 0   ;;  %s2681_s18 = smov 0  }
   0x5   :  { %s2683_s19 = smov 0   ;;  %s2685_s20 = smov 0  }
   0x6 LB: > { %s2023_s21 = sadd.s32 4294967295, %s2642_s20   ;;  %s2024_s22 = sadd.s32 4294967294, %s2642_s20   ;;  %s2642_s20 = sphi %s2685_s20, %s21_s20   ;;  %s2638_s19 = sphi %s2683_s19, %s3374_s19   ;;  %s2634_s18 = sphi %s2681_s18, %s3373_s18   ;;  %s2630_s17 = sphi %s2679_s17, %s3372_s17   ;;  %s2626_s16 = sphi %s2677_s16, %s3371_s16   ;;  %s2622_s15 = sphi %s2675_s15, %s3370_s15  }
   0x7   : > { %s33_s23 = sadd.s32 1, %s2638_s19  ;;  %s112_s24 = sadd.s32 1, %s2630_s17 }
   0x8   : > { %p35_p0 = scmp.ge.s32.totalorder %s33_s23, 2  ;;  %p122_p1 = scmp.ne.s32.totalorder %s2630_s17, %s2626_s16 }
   0x9   : > { %p123_p2 = scmp.eq.s32.totalorder %s2023_s21, 1  ;;  %p128_p3 = scmp.ne.s32.totalorder %s2626_s16, %s2622_s15 }
   0xa   : > { %s3376_s23 = smov (%p35_p0, %s33_s23), 0  ;;  %p129_p5 = scmp.eq.s32.totalorder %s2024_s22, 1 }
   0xb   : > { %p2715_p4 = por %p123_p2, %p122_p1  ;;  %s107_s26 = ssub.s32 %s2638_s19, %s3376_s23 }
   0xc   : > { %p2027_p6 = scmp.ge.s32.totalorder %s2642_s20, 1  ;;  %p110_p7 = scmp.eq.s32.totalorder %s107_s26, 0 }
   0xd   : > { %p2722_p8 = por %p129_p5, %p128_p3  ;;  %p192_p9 = scmp.lt.s32.totalorder %s2642_s20, 3 }
   0xe   : > { %s2728_s28 = scalar_select %p110_p7, %s2630_s17, %s112_s24  }
   0xf   : > { %p193_p10 = pnand %p2027_p6, %p192_p9 }
  0x10   : > { %p226_p11 = scmp.lt.s32.totalorder (!%p193_p10), %s2634_s18, 1  ;;  %s3249_s21 = sand.u32 (!%p193_p10), 1, %s2626_s16  }
  0x11   : > { %196 = sbr.rel (%p193_p10) target bundleno = 1940 (0x794), region = 32  ;;  %s2029_s22 = sshll.u32 (!%p193_p10), %s3249_s21, 2 }
  0x12   : > { %s3258_s26 = scalar_lea.vmem (!%p193_p10), [#allocation4], %s2029_s22  ;;  %s2196_s29 = sshll.u32 (!%p193_p10), %s2634_s18, 6 }
  0x13   : > { %s1913_s6 = scalar_lea.hbm (!%p193_p10), %s3367_s4, %s2196_s29  ;;  %s1884_s8 = scalar_lea.sflag (!%p193_p10), [#allocation5], %s3249_s21 }
  0x14   : > { %s2646_s10 = smov (!%p193_p10), [#allocation4]  }
  0x15   : > { %s2540_s11 = sshll.u32 (!%p193_p10), %s2646_s10, 4  ;;  %s2541_s11 = int_to_ptr.vmem [resolvable:$false] %s2540_s11 }
  0x16   : > { %v257_v0 = vld [vmem:[%s3365_s2 + $0x10] sm:$0xff]  ;;  %v255_v1 = vld [vmem:[%s3365_s2] sm:$0xff]  ;;  %vm263_vm0 = vcmask 261120   ;;  %v2644_v2 = vmov 0   ;;  %s227_s7 = scalar_select %p226_p11, %s2634_s18, 1  ;;  %v258_v4 = vld [vmem:[%s3365_s2 + $0x18] sm:$0xff] }
  0x17   : > { %2531 = vset.pattern.permute.xlu1 %v2644_v2  ;;  %2530 = vset.pattern.permute.xlu0 %v2644_v2  ;;  %v247_v3 = vld [vmem:[%s3364_s1] sm:$0xff]  ;;  %v256_v5 = vld [vmem:[%s3365_s2 + $0x8] sm:$0xff]  ;;  %v262_v12 = vld [vmem:[%s3365_s2 + $0x38] sm:$0xff]  ;;  %vm549_vm1 = vcmask 523264   ;;  %s2542_s12 = scalar_lea.vmem %s2541_s11, 128 }
  0x18   : > { %405 = vperm.xlu1 %2531, %v257_v0   ;;  %395 = vperm.xlu0 %2530, %v255_v1   ;;  %s2199_s14 = sshll.u32 %s227_s7, 5  ;;  %v260_v8 = vld [vmem:[%s3365_s2 + $0x28] sm:$0xff]  ;;  %v259_v9 = vld [vmem:[%s3365_s2 + $0x20] sm:$0xff]  ;;  %v261_v13 = vld [vmem:[%s3365_s2 + $0x30] sm:$0xff]  ;;  %s1915_s7 = sshll.u32 %s3258_s26, 4  ;;  %s1916_s7 = int_to_ptr.vmem [resolvable:$true] %s1915_s7 }
  0x19   : > { %2305 = vmatprep.mubr.msk.f32.mxu0 %vm263_vm0, %v247_v3  ;;  %s2751_s24 = scalar_lea.vmem %s3363_s0, %s2199_s14  ;;  %v248_v14 = vld [vmem:[%s3364_s1 + $0x8] sm:$0xff]  ;;  %v249_v15 = vld [vmem:[%s3364_s1 + $0x10] sm:$0xff]  ;;  %v2068_v16 = vld [vmem:[%s3365_s2 + $0x40] sm:$0xff]  ;;  %s2536_s9 = scalar_lea.vmem %s1916_s7, 64 }
  0x1a   : > { %v2754_v6 = vld [vmem:[%s2751_s24 + $0x18] sm:$0xff]  ;;  %v2757_v7 = vld [vmem:[%s2751_s24 + $0x10] sm:$0xff]  ;;  %v2769_v10 = vld [vmem:[%s2751_s24 + $0x8] sm:$0xff]  ;;  %p2537_p12 = scmp.ne.s32.totalorder %s1916_s7, %s2536_s9  ;;  %p2543_p1 = scmp.lt.s32.totalorder %s1916_s7, %s2541_s11 }
  0x1b   : > { %2297 = vmatprep.subr.mxu0 %v2754_v6  ;;  %v2773_v11 = vld [vmem:[%s2751_s24] sm:$0xff]  ;;  %v250_v17 = vld [vmem:[%s3364_s1 + $0x18] sm:$0xff]  ;;  %v2069_v19 = vld [vmem:[%s3365_s2 + $0x48] sm:$0xff]  ;;  %p2544_p2 = scmp.lt.s32.totalorder %s2542_s12, %s2536_s9 }
  0x1c   : > { %410 = vperm.xlu1 %2531, %v258_v4   ;;  %400 = vperm.xlu0 %2530, %v256_v5   ;;  %v251_v18 = vld [vmem:[%s3364_s1 + $0x20] sm:$0xff]  ;;  %v252_v20 = vld [vmem:[%s3364_s1 + $0x28] sm:$0xff]  ;;  %v253_v21 = vld [vmem:[%s3364_s1 + $0x30] sm:$0xff]  ;;  %p2538_p13 = pnand %p2537_p12, %p2715_p4 }
  0x1d   : > { %2298 = vmatpush3.msra.mxu0 %v2754_v6  ;;  %v2070_v22 = vld [vmem:[%s3365_s2 + $0x50] sm:$0xff]  ;;  %v254_v23 = vld [vmem:[%s3364_s1 + $0x38] sm:$0xff]  ;;  %v2060_v25 = vld [vmem:[%s3364_s1 + $0x40] sm:$0xff]  ;;  %p2545_p3 = por %p2544_p2, %p2543_p1 }
  0x1e   : > { %2299 = vmatprep.subr.mxu0 %v2757_v7  ;;  %v2071_v24 = vld [vmem:[%s3365_s2 + $0x58] sm:$0xff]  ;;  %v2072_v26 = vld [vmem:[%s3365_s2 + $0x60] sm:$0xff]  ;;  %v2073_v27 = vld [vmem:[%s3365_s2 + $0x68] sm:$0xff]  ;;  %p2539_p0 = pneg %p2538_p13 }
  0x1f   : > { %2300 = vmatpush3.msra.mxu0 %v2757_v7  ;;  %v2074_v28 = vld [vmem:[%s3365_s2 + $0x70] sm:$0xff]  ;;  %v2075_v29 = vld [vmem:[%s3365_s2 + $0x78] sm:$0xff]  ;;  %v2844_v30 = vld [vmem:[%s3364_s1 + $0x48] sm:$0xff] }
  0x20   : > { %420 = vperm.xlu1 %2531, %v260_v8   ;;  %415 = vperm.xlu0 %2530, %v259_v9   ;;  %v2850_v31 = vld [vmem:[%s3364_s1 + $0x50] sm:$0xff]  ;;  %v2856_v32 = vld [vmem:[%s3364_s1 + $0x58] sm:$0xff]  ;;  %v2862_v33 = vld [vmem:[%s3364_s1 + $0x60] sm:$0xff]  ;;  %p2546_p5 = pnand %p2545_p3, %p2539_p0 }
  0x21   : > { %2301 = vmatprep.subr.mxu0 %v2769_v10  ;;  %v2868_v34 = vld [vmem:[%s3364_s1 + $0x68] sm:$0xff]  ;;  %v2874_v35 = vld [vmem:[%s3364_s1 + $0x70] sm:$0xff]  ;;  %v2112_v36 = vld [vmem:[%s3365_s2 + $0x80] sm:$0xff] }
  0x22   : > { %2302 = vmatpush3.msra.mxu0 %v2769_v10  ;;  %v2883_v37 = vld [vmem:[%s3364_s1 + $0x78] sm:$0xff]  ;;  %v2113_v38 = vld [vmem:[%s3365_s2 + $0x88] sm:$0xff]  ;;  %v2116_v40 = vld [vmem:[%s3365_s2 + $0xa0] sm:$0xff] }
  0x23   : > { %2303 = vmatprep.subr.mxu0 %v2773_v11  ;;  %v2115_v39 = vld [vmem:[%s3365_s2 + $0x98] sm:$0xff]  ;;  %v2117_v41 = vld [vmem:[%s3365_s2 + $0xa8] sm:$0xff]  ;;  %v2118_v42 = vld [vmem:[%s3365_s2 + $0xb0] sm:$0xff] }
  0x24   : > { %430 = vperm.xlu1 %2531, %v262_v12   ;;  %425 = vperm.xlu0 %2530, %v261_v13   ;;  %v2119_v43 = vld [vmem:[%s3365_s2 + $0xb8] sm:$0xff]  ;;  %v2114_v44 = vld [vmem:[%s3365_s2 + $0x90] sm:$0xff]  ;;  %v2156_v45 = vld [vmem:[%s3365_s2 + $0xc0] sm:$0xff] }
  0x25   : > { %2304 = vmatpush3.msra.mxu0 %v2773_v11  ;;  %v2157_v47 = vld [vmem:[%s3365_s2 + $0xc8] sm:$0xff]  ;;  %v2158_v49 = vld [vmem:[%s3365_s2 + $0xd0] sm:$0xff]  ;;  %v2159_v50 = vld [vmem:[%s3365_s2 + $0xd8] sm:$0xff] }
  0x26   : > { %2306 = vmatmul.mubr.msk.f32.vlgmr.msra.gmra.mxu0 %vm263_vm0, %v248_v14  ;;  %v2160_v52 = vld [vmem:[%s3365_s2 + $0xe0] sm:$0xff]  ;;  %v2161_v54 = vld [vmem:[%s3365_s2 + $0xe8] sm:$0xff]  ;;  %v2162_v56 = vld [vmem:[%s3365_s2 + $0xf0] sm:$0xff] }
  0x27   : > { %2308 = vmatprep.mubr.msk.f32.mxu0 %vm263_vm0, %v249_v15  ;;  %v2163_v57 = vld [vmem:[%s3365_s2 + $0xf8] sm:$0xff] }
  0x28   : > { %800 = vperm.xlu1 %2531, %v2068_v16  }
  0x2a   : > { %2309 = vmatmul.mubr.msk.f32.gmra.mxu0 %vm263_vm0, %v250_v17 }
  0x2b   : > { %2311 = vmatprep.mubr.msk.f32.mxu0 %vm263_vm0, %v251_v18 }
  0x2c   : > { %805 = vperm.xlu1 %2531, %v2069_v19  }
  0x2e   : > { %2312 = vmatmul.mubr.msk.f32.gmra.mxu0 %vm263_vm0, %v252_v20 }
  0x2f   : > { %2314 = vmatprep.mubr.msk.f32.mxu0 %vm263_vm0, %v253_v21 }
  0x30   : > { %810 = vperm.xlu1 %2531, %v2070_v22  }
  0x32   : > { %2315 = vmatmul.mubr.msk.f32.gmra.mxu0 %vm263_vm0, %v254_v23 }
  0x33   : > { %2347 = vmatprep.mubr.msk.f32.mxu0 %vm263_vm0, %v2060_v25 }
  0x34   : > { %815 = vperm.xlu1 %2531, %v2071_v24  }
  0x38   : > { %820 = vperm.xlu1 %2531, %v2072_v26   ;;  %v238_v26 = vlaneseq }
  0x3c   : > { %825 = vperm.xlu1 %2531, %v2073_v27  }
  0x40   : > { %830 = vperm.xlu1 %2531, %v2074_v28  }
  0x42   : > { %517 = vxpose.xlu0.b32.start [1/8] (short) (narrow) %v247_v3, 32 }
  0x44   : > { %835 = vperm.xlu1 %2531, %v2075_v29   ;;  %v2932_v29 = vshrl.u32 %v238_v26, 7 }
  0x46   : > { %518 = vxpose.xlu0.b32.cont [2/8] (short) (narrow) %v248_v14, 32 }
  0x4a   : > { %519 = vxpose.xlu0.b32.cont [3/8] (short) (narrow) %v249_v15, 32 }
  0x4e   : > { %520 = vxpose.xlu0.b32.cont [4/8] (short) (narrow) %v250_v17, 32 }
  0x52   : > { %521 = vxpose.xlu0.b32.cont [5/8] (short) (narrow) %v251_v18, 32 }
  0x56   : > { %522 = vxpose.xlu0.b32.cont [6/8] (short) (narrow) %v252_v20, 32 }
  0x5a   : > { %523 = vxpose.xlu0.b32.cont [7/8] (short) (narrow) %v253_v21, 32 }
  0x5e   : > { %524 = vxpose.xlu0.b32.end [8/8] (short) (narrow) %v254_v23, 32 }
  0x6d   : > { %922 = vxpose.xlu1.b32.start [1/8] (short) (narrow) %v2060_v25, 32 }
  0x71   : > { %923 = vxpose.xlu1.b32.cont [2/8] (short) (narrow) %v2844_v30, 32 }
  0x75   : > { %924 = vxpose.xlu1.b32.cont [3/8] (short) (narrow) %v2850_v31, 32 }
  0x79   : > { %925 = vxpose.xlu1.b32.cont [4/8] (short) (narrow) %v2856_v32, 32 }
  0x7d   : > { %926 = vxpose.xlu1.b32.cont [5/8] (short) (narrow) %v2862_v33, 32 }
  0x81   : > { %927 = vxpose.xlu1.b32.cont [6/8] (short) (narrow) %v2868_v34, 32 }
  0x85   : > { %928 = vxpose.xlu1.b32.cont [7/8] (short) (narrow) %v2874_v35, 32 }
  0x87   : > { %1204 = vperm.xlu0 %2530, %v2112_v36  }
  0x89   : > { %929 = vxpose.xlu1.b32.end [8/8] (short) (narrow) %v2883_v37, 32 }
  0x8b   : > { %1209 = vperm.xlu0 %2530, %v2113_v38  }
  0x8f   : > { %1219 = vperm.xlu0 %2530, %v2115_v39  }
  0x93   : > { %1224 = vperm.xlu0 %2530, %v2116_v40   ;;  %v396_v46 = vpop.permute.xlu0 %395  ;;  %v406_v58 = vpop.permute.xlu1 %405  ;;  %v2937_v40 = vadd.s32 8, %v2932_v29 }
  0x97   : > { %1229 = vperm.xlu0 %2530, %v2117_v41   ;;  %v401_v48 = vpop.permute.xlu0 %400  ;;  %v411_v59 = vpop.permute.xlu1 %410  ;;  %v2940_v41 = vadd.s32 16, %v2932_v29 }
  0x9b   : > { %1234 = vperm.xlu0 %2530, %v2118_v42   ;;  %v416_v51 = vpop.permute.xlu0 %415  ;;  %v421_v63 = vpop.permute.xlu1 %420  ;;  %v2943_v42 = vadd.s32 24, %v2932_v29 }
  0x9f   : > { %1239 = vperm.xlu0 %2530, %v2119_v43   ;;  %v426_v53 = vpop.permute.xlu0 %425  ;;  %v431_v4 = vpop.permute.xlu1 %430 }
  0xa3   : > { %v2934_v39 = vpop.permute.xlu1 %800 }
  0xa7   : > { %1214 = vperm.xlu1 %2531, %v2114_v44   ;;  %v2946_v44 = vadd.s32 32, %v2932_v29 }
  0xab   : > { %1608 = vperm.xlu1 %2531, %v2156_v45   ;;  %v2949_v45 = vadd.s32 40, %v2932_v29 }
  0xaf   : > { %1613 = vperm.xlu1 %2531, %v2157_v47   ;;  %v2955_v47 = vadd.s32 56, %v2932_v29 }
  0xb3   : > { %1618 = vperm.xlu1 %2531, %v2158_v49  }
  0xb7   : > { %1623 = vperm.xlu1 %2531, %v2159_v50  }
  0xbb   : > { %1628 = vperm.xlu1 %2531, %v2160_v52   ;;  %v2961_v52 = vpop.permute.xlu1 %805 }
  0xbe   : > { %v533_v55 = vpop.trf.xlu0 }
  0xbf   : > { %1633 = vperm.xlu1 %2531, %v2161_v54   ;;  %2333 = vmatprep.mubr.msk.f32.mxu1 %vm549_vm1, %v533_v55 }
  0xc3   : > { %1638 = vperm.xlu1 %2531, %v2162_v56  }
  0xc7   : > { %1643 = vperm.xlu1 %2531, %v2163_v57  }
  0xe6   : > { %v2307_v60 = vpop.f32.mrf.mxu0 }
  0xe7   : > { %v434_v13 = vsub.f32 %v401_v48, %v2307_v60 }
  0xe8   : > { %v354_v61 = vpop.f32.mrf.mxu0 }
  0xe9   : > { %v433_v8 = vsub.f32 %v396_v46, %v354_v61  ;;  %v2952_v46 = vadd.s32 48, %v2932_v29 }
  0xea   : > { %v2310_v62 = vpop.f32.mrf.mxu0 }
  0xeb   : > { %v436_v15 = vsub.f32 %v411_v59, %v2310_v62 }
  0xec   : > { %v364_v0 = vpop.f32.mrf.mxu0 }
  0xed   : > { %v435_v16 = vsub.f32 %v406_v58, %v364_v0 }
  0xee   : > { %v2313_v1 = vpop.f32.mrf.mxu0 }
  0xef   : > { %v438_v9 = vsub.f32 %v421_v63, %v2313_v1  ;;  %v2967_v63 = vpop.permute.xlu1 %810 }
  0xf0   : > { %v374_v2 = vpop.f32.mrf.mxu0 }
  0xf1   : > { %v437_v3 = vsub.f32 %v416_v51, %v374_v2  ;;  %v442_v19 = vmin.f32 %v434_v13, %v438_v9 }
  0xf2   : > { %v2316_v5 = vpop.f32.mrf.mxu0 }
  0xf3   : > { %v440_v12 = vsub.f32 %v431_v4, %v2316_v5  ;;  %v441_v17 = vmin.f32 %v433_v8, %v437_v3  ;;  %v2969_v4 = vpop.permute.xlu1 %815 }
  0xf4   : > { %v384_v14 = vpop.f32.mrf.mxu0 }
  0xf5   : > { %v439_v18 = vsub.f32 %v426_v53, %v384_v14  ;;  %v444_v20 = vmin.f32 %v436_v15, %v440_v12  ;;  %v445_v22 = vmin.f32 %v441_v17, %v442_v19 }
  0xf7   : > { %v443_v21 = vmin.f32 %v435_v16, %v439_v18 }
  0xf9   : > { %v446_v23 = vmin.f32 %v443_v21, %v444_v20 }
  0xfb   : > { %v447_v24 = vmin.f32 %v445_v22, %v446_v23 }
  0xfd   : > { %v448_v25 = vrot.slane %v447_v24, 4 }
  0xff   : > { %v449_v27 = vmin.f32 %v447_v24, %v448_v25 }
 0x101   : > { %v450_v28 = vrot.slane %v449_v27, 2 }
 0x103   : > { %v451_v36 = vmin.f32 %v449_v27, %v450_v28 }
 0x105   : > { %v452_v38 = vrot.slane %v451_v36, 1 }
 0x107   : > { %v453_v43 = vmin.f32 %v451_v36, %v452_v38 }
 0x109   : > { %vm454_vm2 = vcmp.le.f32.partialorder %v433_v8, %v453_v43  ;;  %vm455_vm3 = vcmp.le.f32.partialorder %v434_v13, %v453_v43  ;;  %vm456_vm4 = vcmp.le.f32.partialorder %v435_v16, %v453_v43  ;;  %vm457_vm5 = vcmp.le.f32.partialorder %v436_v15, %v453_v43  ;;  %v534_v15 = vpop.trf.xlu0 }
 0x10a   : > { %vm458_vm6 = vcmp.le.f32.partialorder %v437_v3, %v453_v43  ;;  %vm459_vm7 = vcmp.le.f32.partialorder %v438_v9, %v453_v43  ;;  %vm460_vm8 = vcmp.le.f32.partialorder %v439_v18, %v453_v43  ;;  %vm461_vm9 = vcmp.le.f32.partialorder %v440_v12, %v453_v43  ;;  %v2971_v9 = vpop.permute.xlu1 %820 }
 0x10b   : > { %v462_v48 = vsel %vm454_vm2, %v2932_v29, 64  ;;  %v463_v49 = vsel %vm455_vm3, %v2937_v40, 64  ;;  %v464_v50 = vsel %vm456_vm4, %v2940_v41, 64  ;;  %v465_v51 = vsel %vm457_vm5, %v2943_v42, 64 }
 0x10c   : > { %v466_v53 = vsel %vm458_vm6, %v2946_v44, 64  ;;  %v467_v54 = vsel %vm459_vm7, %v2949_v45, 64  ;;  %v468_v55 = vsel %vm460_vm8, %v2952_v46, 64  ;;  %v469_v56 = vsel %vm461_vm9, %v2955_v47, 64 }
 0x10d   : > { %vm470_vm10 = vcmp.lt.s32.totalorder %v462_v48, %v466_v53  ;;  %vm472_vm11 = vcmp.lt.s32.totalorder %v463_v49, %v467_v54  ;;  %vm474_vm12 = vcmp.lt.s32.totalorder %v464_v50, %v468_v55  ;;  %vm476_vm13 = vcmp.lt.s32.totalorder %v465_v51, %v469_v56  ;;  %v535_v17 = vpop.trf.xlu0 }
 0x10e   : > { %v471_v57 = vsel %vm470_vm10, %v462_v48, %v466_v53  ;;  %v473_v58 = vsel %vm472_vm11, %v463_v49, %v467_v54  ;;  %v475_v59 = vsel %vm474_vm12, %v464_v50, %v468_v55  ;;  %v477_v60 = vsel %vm476_vm13, %v465_v51, %v469_v56  ;;  %v826_v14 = vpop.permute.xlu1 %825 }
 0x10f   : > { %vm478_vm14 = vcmp.lt.s32.totalorder %v471_v57, %v473_v58  ;;  %vm480_vm15 = vcmp.lt.s32.totalorder %v475_v59, %v477_v60  ;;  %v2645_v13 = vmov 1.0  }
 0x110   : > { %v479_v61 = vsel %vm478_vm14, %v471_v57, %v473_v58  ;;  %v481_v62 = vsel %vm480_vm15, %v475_v59, %v477_v60 }
 0x111   : > { %vm482_vm2 = vcmp.lt.s32.totalorder %v479_v61, %v481_v62  ;;  %v536_v19 = vpop.trf.xlu0 }
 0x112   : > { %v483_v0 = vsel %vm482_vm2, %v479_v61, %v481_v62  ;;  %v831_v16 = vpop.permute.xlu1 %830 }
 0x113   : > { %v484_v1 = vrot.slane %v483_v0, 4 }
 0x115   : > { %vm485_vm3 = vcmp.lt.s32.totalorder %v483_v0, %v484_v1 }
 0x116   : > { %v486_v2 = vsel %vm485_vm3, %v483_v0, %v484_v1  ;;  %v836_v18 = vpop.permute.xlu1 %835 }
 0x117   : > { %v487_v3 = vrot.slane %v486_v2, 2 }
 0x119   : > { %vm488_vm4 = vcmp.lt.s32.totalorder %v486_v2, %v487_v3 }
 0x11a   : > { %v489_v5 = vsel %vm488_vm4, %v486_v2, %v487_v3  ;;  %v938_v20 = vpop.trf.xlu1 }
 0x11b   : > { %v490_v8 = vrot.slane %v489_v5, 1 }
 0x11d   : > { %vm491_vm5 = vcmp.lt.s32.totalorder %v489_v5, %v490_v8 }
 0x11e   : > { %v2973_v12 = vsel %vm491_vm5, %v489_v5, %v490_v8 }
 0x11f   : > { %vm500_vm6 = vcmp.eq.s32.totalorder %v2955_v47, %v2973_v12  ;;  %vm499_vm7 = vcmp.eq.s32.totalorder %v2952_v46, %v2973_v12  ;;  %vm498_vm8 = vcmp.eq.s32.totalorder %v2949_v45, %v2973_v12  ;;  %vm497_vm9 = vcmp.eq.s32.totalorder %v2946_v44, %v2973_v12 }
 0x120   : > { %2317 = vmatprep.subr.msk.mxu1 %vm500_vm6, %v2645_v13  ;;  %vm496_vm10 = vcmp.eq.s32.totalorder %v2943_v42, %v2973_v12  ;;  %vm495_vm11 = vcmp.eq.s32.totalorder %v2940_v41, %v2973_v12  ;;  %vm494_vm12 = vcmp.eq.s32.totalorder %v2937_v40, %v2973_v12  ;;  %vm493_vm13 = vcmp.eq.s32.totalorder %v2932_v29, %v2973_v12 }
 0x121   : > { %2318 = vmatpush3.msk.msra.mxu1 %vm500_vm6, %v2645_v13 }
 0x122   : > { %2319 = vmatprep.subr.msk.mxu1 %vm499_vm7, %v2645_v13 }
 0x123   : > { %2320 = vmatpush3.msk.msra.mxu1 %vm499_vm7, %v2645_v13 }
 0x124   : > { %2321 = vmatprep.subr.msk.mxu1 %vm498_vm8, %v2645_v13 }
 0x125   : > { %2322 = vmatpush3.msk.msra.mxu1 %vm498_vm8, %v2645_v13 }
 0x126   : > { %2323 = vmatprep.subr.msk.mxu1 %vm497_vm9, %v2645_v13 }
 0x127   : > { %2324 = vmatpush3.msk.msra.mxu1 %vm497_vm9, %v2645_v13 }
 0x128   : > { %2325 = vmatprep.subr.msk.mxu1 %vm496_vm10, %v2645_v13 }
 0x129   : > { %2326 = vmatpush3.msk.msra.mxu1 %vm496_vm10, %v2645_v13 }
 0x12a   : > { %2327 = vmatprep.subr.msk.mxu1 %vm495_vm11, %v2645_v13 }
 0x12b   : > { %2328 = vmatpush3.msk.msra.mxu1 %vm495_vm11, %v2645_v13 }
 0x12c   : > { %2329 = vmatprep.subr.msk.mxu1 %vm494_vm12, %v2645_v13 }
 0x12d   : > { %2330 = vmatpush3.msk.msra.mxu1 %vm494_vm12, %v2645_v13 }
 0x12e   : > { %2331 = vmatprep.subr.msk.mxu1 %vm493_vm13, %v2645_v13 }
 0x12f   : > { %2332 = vmatpush3.msk.msra.mxu1 %vm493_vm13, %v2645_v13 }
 0x130   : > { %2334 = vmatmul.mubr.msk.f32.vlgmr.msra.gmra.mxu1 %vm549_vm1, %v534_v15 }
 0x131   : > { %2336 = vmatprep.mubr.msk.f32.mxu1 %vm549_vm1, %v535_v17 }
 0x134   : > { %2337 = vmatmul.mubr.msk.f32.gmra.mxu1 %vm549_vm1, %v536_v19 }
 0x135   : > { %2375 = vmatprep.mubr.msk.f32.mxu1 %vm549_vm1, %v938_v20 }
 0x1f0   : > { %v2335_v21 = vpop.f32.mrf.mxu1 }
 0x1f1   : > { %v3020_v27 = vsub.f32 %v2769_v10, %v2335_v21 }
 0x1f2   : > { %v628_v22 = vpop.f32.mrf.mxu1 }
 0x1f3   : > { %v3025_v28 = vsub.f32 %v2773_v11, %v628_v22 }
 0x1f4   : > { %v2338_v23 = vpop.f32.mrf.mxu1 }
 0x1f5   : > { %v3012_v24 = vsub.f32 %v2754_v6, %v2338_v23 }
 0x1f6   : > { %v638_v25 = vpop.f32.mrf.mxu1 }
 0x1f7   : > { %v3015_v26 = vsub.f32 %v2757_v7, %v638_v25  ;;  %2339 = vmatprep.subr.mxu0 %v3012_v24 }
 0x1f8   : > { %2340 = vmatpush3.msra.mxu0 %v3012_v24 }
 0x1f9   : > { %2341 = vmatprep.subr.mxu0 %v3015_v26 }
 0x1fa   : > { %2342 = vmatpush3.msra.mxu0 %v3015_v26 }
 0x1fb   : > { %2343 = vmatprep.subr.mxu0 %v3020_v27 }
 0x1fc   : > { %2344 = vmatpush3.msra.mxu0 %v3020_v27 }
 0x1fd   : > { %2345 = vmatprep.subr.mxu0 %v3025_v28 }
 0x1fe   : > { %2346 = vmatpush3.msra.mxu0 %v3025_v28 }
 0x1ff   : > { %2348 = vmatmul.mubr.msk.f32.vlgmr.msra.gmra.mxu0 %vm263_vm0, %v2844_v30 }
 0x200   : > { %2350 = vmatprep.mubr.msk.f32.mxu0 %vm263_vm0, %v2850_v31 }
 0x203   : > { %2351 = vmatmul.mubr.msk.f32.gmra.mxu0 %vm263_vm0, %v2856_v32 }
 0x204   : > { %2353 = vmatprep.mubr.msk.f32.mxu0 %vm263_vm0, %v2862_v33 }
 0x207   : > { %2354 = vmatmul.mubr.msk.f32.gmra.mxu0 %vm263_vm0, %v2868_v34 }
 0x208   : > { %2356 = vmatprep.mubr.msk.f32.mxu0 %vm263_vm0, %v2874_v35 }
 0x20b   : > { %2357 = vmatmul.mubr.msk.f32.gmra.mxu0 %vm263_vm0, %v2883_v37 }
 0x2bf   : > { %v2349_v6 = vpop.f32.mrf.mxu0 }
 0x2c0   : > { %v839_v34 = vsub.f32 %v2961_v52, %v2349_v6  ;;  %v939_v6 = vpop.trf.xlu1 }
 0x2c1   : > { %v759_v7 = vpop.f32.mrf.mxu0 }
 0x2c2   : > { %v838_v33 = vsub.f32 %v2934_v39, %v759_v7 }
 0x2c3   : > { %v2352_v10 = vpop.f32.mrf.mxu0 }
 0x2c4   : > { %v841_v35 = vsub.f32 %v2969_v4, %v2352_v10  ;;  %v940_v7 = vpop.trf.xlu1 }
 0x2c5   : > { %v769_v11 = vpop.f32.mrf.mxu0 }
 0x2c6   : > { %v840_v37 = vsub.f32 %v2967_v63, %v769_v11  ;;  %v2104_v11 = vld [vmem:[%s3364_s1 + $0x80] sm:$0xff] }
 0x2c7   : > { %v2355_v30 = vpop.f32.mrf.mxu0  ;;  %2389 = vmatprep.mubr.msk.f32.mxu0 %vm263_vm0, %v2104_v11  ;;  %1326 = vxpose.xlu0.b32.start [1/8] (short) (narrow) %v2104_v11, 32 }
 0x2c8   : > { %v843_v38 = vsub.f32 %v826_v14, %v2355_v30  ;;  %v941_v10 = vpop.trf.xlu1  ;;  %v2105_v30 = vld [vmem:[%s3364_s1 + $0x88] sm:$0xff] }
 0x2c9   : > { %v779_v31 = vpop.f32.mrf.mxu0 }
 0x2ca   : > { %v842_v32 = vsub.f32 %v2971_v9, %v779_v31  ;;  %v847_v51 = vmin.f32 %v839_v34, %v843_v38  ;;  %v2106_v31 = vld [vmem:[%s3364_s1 + $0x90] sm:$0xff] }
 0x2cb   : > { %v2358_v36 = vpop.f32.mrf.mxu0  ;;  %1327 = vxpose.xlu0.b32.cont [2/8] (short) (narrow) %v2105_v30, 32 }
 0x2cc   : > { %v845_v43 = vsub.f32 %v836_v18, %v2358_v36  ;;  %v846_v49 = vmin.f32 %v838_v33, %v842_v32  ;;  %v2108_v36 = vld [vmem:[%s3364_s1 + $0xa0] sm:$0xff] }
 0x2cd   : > { %v789_v48 = vpop.f32.mrf.mxu0 }
 0x2ce   : > { %v844_v50 = vsub.f32 %v831_v16, %v789_v48  ;;  %v849_v53 = vmin.f32 %v841_v35, %v845_v43  ;;  %v850_v55 = vmin.f32 %v846_v49, %v847_v51 }
 0x2cf   : > { %1328 = vxpose.xlu0.b32.cont [3/8] (short) (narrow) %v2106_v31, 32 }
 0x2d0   : > { %v848_v54 = vmin.f32 %v840_v37, %v844_v50 }
 0x2d2   : > { %v851_v56 = vmin.f32 %v848_v54, %v849_v53 }
 0x2d4   : > { %v852_v57 = vmin.f32 %v850_v55, %v851_v56 }
 0x2d6   : > { %v853_v58 = vrot.slane %v852_v57, 4 }
 0x2d8   : > { %v854_v59 = vmin.f32 %v852_v57, %v853_v58 }
 0x2da   : > { %v855_v39 = vrot.slane %v854_v59, 2 }
 0x2dc   : > { %v856_v60 = vmin.f32 %v854_v59, %v855_v39 }
 0x2de   : > { %v857_v61 = vrot.slane %v856_v60, 1 }
 0x2e0   : > { %v858_v62 = vmin.f32 %v856_v60, %v857_v61 }
 0x2e2   : > { %vm859_vm14 = vcmp.le.f32.partialorder %v838_v33, %v858_v62  ;;  %vm860_vm15 = vcmp.le.f32.partialorder %v839_v34, %v858_v62  ;;  %vm861_vm2 = vcmp.le.f32.partialorder %v840_v37, %v858_v62  ;;  %vm862_vm3 = vcmp.le.f32.partialorder %v841_v35, %v858_v62  ;;  %v2109_v33 = vld [vmem:[%s3364_s1 + $0xa8] sm:$0xff] }
 0x2e3   : > { %vm863_vm4 = vcmp.le.f32.partialorder %v842_v32, %v858_v62  ;;  %vm864_vm5 = vcmp.le.f32.partialorder %v843_v38, %v858_v62  ;;  %vm865_vm6 = vcmp.le.f32.partialorder %v844_v50, %v858_v62  ;;  %vm866_vm7 = vcmp.le.f32.partialorder %v845_v43, %v858_v62  ;;  %v2107_v32 = vld [vmem:[%s3364_s1 + $0x98] sm:$0xff]  ;;  %v2110_v38 = vld [vmem:[%s3364_s1 + $0xb0] sm:$0xff] }
 0x2e4   : > { %v867_v52 = vsel %vm859_vm14, %v2932_v29, 64  ;;  %v868_v63 = vsel %vm860_vm15, %v2937_v40, 64  ;;  %v869_v0 = vsel %vm861_vm2, %v2940_v41, 64  ;;  %v870_v1 = vsel %vm862_vm3, %v2943_v42, 64  ;;  %1329 = vxpose.xlu0.b32.cont [4/8] (short) (narrow) %v2107_v32, 32  ;;  %v2111_v43 = vld [vmem:[%s3364_s1 + $0xb8] sm:$0xff] }
 0x2e5   : > { %v871_v2 = vsel %vm863_vm4, %v2946_v44, 64  ;;  %v872_v3 = vsel %vm864_vm5, %v2949_v45, 64  ;;  %v873_v4 = vsel %vm865_vm6, %v2952_v46, 64  ;;  %v874_v5 = vsel %vm866_vm7, %v2955_v47, 64 }
 0x2e6   : > { %vm875_vm8 = vcmp.lt.s32.totalorder %v867_v52, %v871_v2  ;;  %vm877_vm9 = vcmp.lt.s32.totalorder %v868_v63, %v872_v3  ;;  %vm879_vm10 = vcmp.lt.s32.totalorder %v869_v0, %v873_v4  ;;  %vm881_vm11 = vcmp.lt.s32.totalorder %v870_v1, %v874_v5 }
 0x2e7   : > { %v876_v8 = vsel %vm875_vm8, %v867_v52, %v871_v2  ;;  %v878_v9 = vsel %vm877_vm9, %v868_v63, %v872_v3  ;;  %v880_v14 = vsel %vm879_vm10, %v869_v0, %v873_v4  ;;  %v882_v15 = vsel %vm881_vm11, %v870_v1, %v874_v5  ;;  %v1215_v3 = vpop.permute.xlu1 %1214 }
 0x2e8   : > { %vm883_vm12 = vcmp.lt.s32.totalorder %v876_v8, %v878_v9  ;;  %vm885_vm13 = vcmp.lt.s32.totalorder %v880_v14, %v882_v15  ;;  %1330 = vxpose.xlu0.b32.cont [5/8] (short) (narrow) %v2108_v36, 32 }
 0x2e9   : > { %v884_v16 = vsel %vm883_vm12, %v876_v8, %v878_v9  ;;  %v886_v17 = vsel %vm885_vm13, %v880_v14, %v882_v15 }
 0x2ea   : > { %vm887_vm14 = vcmp.lt.s32.totalorder %v884_v16, %v886_v17 }
 0x2eb   : > { %v888_v18 = vsel %vm887_vm14, %v884_v16, %v886_v17 }
 0x2ec   : > { %v889_v19 = vrot.slane %v888_v18, 4  ;;  %1331 = vxpose.xlu0.b32.cont [6/8] (short) (narrow) %v2109_v33, 32 }
 0x2ee   : > { %vm890_vm15 = vcmp.lt.s32.totalorder %v888_v18, %v889_v19 }
 0x2ef   : > { %v891_v20 = vsel %vm890_vm15, %v888_v18, %v889_v19 }
 0x2f0   : > { %v892_v21 = vrot.slane %v891_v20, 2  ;;  %1332 = vxpose.xlu0.b32.cont [7/8] (short) (narrow) %v2110_v38, 32 }
 0x2f2   : > { %vm893_vm2 = vcmp.lt.s32.totalorder %v891_v20, %v892_v21 }
 0x2f3   : > { %v894_v22 = vsel %vm893_vm2, %v891_v20, %v892_v21 }
 0x2f4   : > { %v895_v23 = vrot.slane %v894_v22, 1  ;;  %1333 = vxpose.xlu0.b32.end [8/8] (short) (narrow) %v2111_v43, 32 }
 0x2f6   : > { %vm896_vm3 = vcmp.lt.s32.totalorder %v894_v22, %v895_v23 }
 0x2f7   : > { %v3058_v25 = vsel %vm896_vm3, %v894_v22, %v895_v23 }
 0x2f8   : > { %vm905_vm4 = vcmp.eq.s32.totalorder %v2955_v47, %v3058_v25  ;;  %vm904_vm5 = vcmp.eq.s32.totalorder %v2952_v46, %v3058_v25  ;;  %vm903_vm6 = vcmp.eq.s32.totalorder %v2949_v45, %v3058_v25  ;;  %vm902_vm7 = vcmp.eq.s32.totalorder %v2946_v44, %v3058_v25 }
 0x2f9   : > { %2359 = vmatprep.subr.msk.mxu1 %vm905_vm4, %v2645_v13  ;;  %vm901_vm8 = vcmp.eq.s32.totalorder %v2943_v42, %v3058_v25  ;;  %vm900_vm9 = vcmp.eq.s32.totalorder %v2940_v41, %v3058_v25  ;;  %vm899_vm10 = vcmp.eq.s32.totalorder %v2937_v40, %v3058_v25  ;;  %vm898_vm11 = vcmp.eq.s32.totalorder %v2932_v29, %v3058_v25 }
 0x2fa   : > { %2360 = vmatpush3.msk.msra.mxu1 %vm905_vm4, %v2645_v13 }
 0x2fb   : > { %2361 = vmatprep.subr.msk.mxu1 %vm904_vm5, %v2645_v13 }
 0x2fc   : > { %2362 = vmatpush3.msk.msra.mxu1 %vm904_vm5, %v2645_v13 }
 0x2fd   : > { %2363 = vmatprep.subr.msk.mxu1 %vm903_vm6, %v2645_v13 }
 0x2fe   : > { %2364 = vmatpush3.msk.msra.mxu1 %vm903_vm6, %v2645_v13 }
 0x2ff   : > { %2365 = vmatprep.subr.msk.mxu1 %vm902_vm7, %v2645_v13 }
 0x300   : > { %2366 = vmatpush3.msk.msra.mxu1 %vm902_vm7, %v2645_v13 }
 0x301   : > { %2367 = vmatprep.subr.msk.mxu1 %vm901_vm8, %v2645_v13 }
 0x302   : > { %2368 = vmatpush3.msk.msra.mxu1 %vm901_vm8, %v2645_v13 }
 0x303   : > { %2369 = vmatprep.subr.msk.mxu1 %vm900_vm9, %v2645_v13 }
 0x304   : > { %2370 = vmatpush3.msk.msra.mxu1 %vm900_vm9, %v2645_v13 }
 0x305   : > { %2371 = vmatprep.subr.msk.mxu1 %vm899_vm10, %v2645_v13 }
 0x306   : > { %2372 = vmatpush3.msk.msra.mxu1 %vm899_vm10, %v2645_v13 }
 0x307   : > { %2373 = vmatprep.subr.msk.mxu1 %vm898_vm11, %v2645_v13 }
 0x308   : > { %2374 = vmatpush3.msk.msra.mxu1 %vm898_vm11, %v2645_v13 }
 0x309   : > { %2376 = vmatmul.mubr.msk.f32.vlgmr.msra.gmra.mxu1 %vm549_vm1, %v939_v6 }
 0x30a   : > { %2378 = vmatprep.mubr.msk.f32.mxu1 %vm549_vm1, %v940_v7 }
 0x30d   : > { %2379 = vmatmul.mubr.msk.f32.gmra.mxu1 %vm549_vm1, %v941_v10 }
 0x3c9   : > { %v2377_v34 = vpop.f32.mrf.mxu1 }
 0x3ca   : > { %v3129_v51 = vsub.f32 %v3020_v27, %v2377_v34 }
 0x3cb   : > { %v1032_v48 = vpop.f32.mrf.mxu1 }
 0x3cc   : > { %v3134_v53 = vsub.f32 %v3025_v28, %v1032_v48 }
 0x3cd   : > { %v2380_v35 = vpop.f32.mrf.mxu1 }
 0x3ce   : > { %v3121_v37 = vsub.f32 %v3012_v24, %v2380_v35  ;;  %v1205_v24 = vpop.permute.xlu0 %1204 }
 0x3cf   : > { %v1042_v49 = vpop.f32.mrf.mxu1 }
 0x3d0   : > { %v3124_v50 = vsub.f32 %v3015_v26, %v1042_v49  ;;  %2381 = vmatprep.subr.mxu0 %v3121_v37 }
 0x3d1   : > { %2382 = vmatpush3.msra.mxu0 %v3121_v37 }
 0x3d2   : > { %2383 = vmatprep.subr.mxu0 %v3124_v50  ;;  %v1210_v26 = vpop.permute.xlu0 %1209 }
 0x3d3   : > { %2384 = vmatpush3.msra.mxu0 %v3124_v50 }
 0x3d4   : > { %2385 = vmatprep.subr.mxu0 %v3129_v51 }
 0x3d5   : > { %2386 = vmatpush3.msra.mxu0 %v3129_v51 }
 0x3d6   : > { %2387 = vmatprep.subr.mxu0 %v3134_v53  ;;  %v1220_v27 = vpop.permute.xlu0 %1219 }
 0x3d7   : > { %2388 = vmatpush3.msra.mxu0 %v3134_v53 }
 0x3d8   : > { %2390 = vmatmul.mubr.msk.f32.vlgmr.msra.gmra.mxu0 %vm263_vm0, %v2105_v30 }
 0x3d9   : > { %2392 = vmatprep.mubr.msk.f32.mxu0 %vm263_vm0, %v2106_v31 }
 0x3da   : > { %v1225_v28 = vpop.permute.xlu0 %1224 }
 0x3dc   : > { %2393 = vmatmul.mubr.msk.f32.gmra.mxu0 %vm263_vm0, %v2107_v32 }
 0x3dd   : > { %2395 = vmatprep.mubr.msk.f32.mxu0 %vm263_vm0, %v2108_v36 }
 0x3de   : > { %v1230_v54 = vpop.permute.xlu0 %1229 }
 0x3e0   : > { %2396 = vmatmul.mubr.msk.f32.gmra.mxu0 %vm263_vm0, %v2109_v33 }
 0x3e1   : > { %2398 = vmatprep.mubr.msk.f32.mxu0 %vm263_vm0, %v2110_v38 }
 0x3e2   : > { %v1235_v55 = vpop.permute.xlu0 %1234 }
 0x3e4   : > { %2399 = vmatmul.mubr.msk.f32.gmra.mxu0 %vm263_vm0, %v2111_v43 }
 0x3e6   : > { %v1240_v56 = vpop.permute.xlu0 %1239 }
 0x3ea   : > { %v1342_v57 = vpop.trf.xlu0 }
 0x3eb   : > { %2417 = vmatprep.mubr.msk.f32.mxu1 %vm549_vm1, %v1342_v57 }
 0x498   : > { %v2391_v58 = vpop.f32.mrf.mxu0 }
 0x499   : > { %v1243_v4 = vsub.f32 %v1210_v26, %v2391_v58 }
 0x49a   : > { %v1163_v59 = vpop.f32.mrf.mxu0 }
 0x49b   : > { %v1242_v0 = vsub.f32 %v1205_v24, %v1163_v59 }
 0x49c   : > { %v2394_v39 = vpop.f32.mrf.mxu0 }
 0x49d   : > { %v1245_v8 = vsub.f32 %v1220_v27, %v2394_v39 }
 0x49e   : > { %v1173_v60 = vpop.f32.mrf.mxu0 }
 0x49f   : > { %v1244_v9 = vsub.f32 %v1215_v3, %v1173_v60  ;;  %v2154_v3 = vld [vmem:[%s3364_s1 + $0xf0] sm:$0xff] }
 0x4a0   : > { %v2397_v61 = vpop.f32.mrf.mxu0 }
 0x4a1   : > { %v1247_v1 = vsub.f32 %v1230_v54, %v2397_v61  ;;  %v1343_v61 = vpop.trf.xlu0 }
 0x4a2   : > { %v1183_v62 = vpop.f32.mrf.mxu0 }
 0x4a3   : > { %v1246_v52 = vsub.f32 %v1225_v28, %v1183_v62  ;;  %v1251_v16 = vmin.f32 %v1243_v4, %v1247_v1  ;;  %v2148_v62 = vld [vmem:[%s3364_s1 + $0xc0] sm:$0xff] }
 0x4a4   : > { %v2400_v63 = vpop.f32.mrf.mxu0  ;;  %2431 = vmatprep.mubr.msk.f32.mxu0 %vm263_vm0, %v2148_v62  ;;  %1730 = vxpose.xlu1.b32.start [1/8] (short) (narrow) %v2148_v62, 32 }
 0x4a5   : > { %v1249_v2 = vsub.f32 %v1240_v56, %v2400_v63  ;;  %v1250_v14 = vmin.f32 %v1242_v0, %v1246_v52  ;;  %v2150_v63 = vld [vmem:[%s3364_s1 + $0xd0] sm:$0xff] }
 0x4a6   : > { %v1193_v5 = vpop.f32.mrf.mxu0 }
 0x4a7   : > { %v1248_v15 = vsub.f32 %v1235_v55, %v1193_v5  ;;  %v1253_v17 = vmin.f32 %v1245_v8, %v1249_v2  ;;  %v1254_v19 = vmin.f32 %v1250_v14, %v1251_v16 }
 0x4a9   : > { %v1252_v18 = vmin.f32 %v1244_v9, %v1248_v15 }
 0x4ab   : > { %v1255_v20 = vmin.f32 %v1252_v18, %v1253_v17 }
 0x4ad   : > { %v1256_v21 = vmin.f32 %v1254_v19, %v1255_v20 }
 0x4af   : > { %v1257_v22 = vrot.slane %v1256_v21, 4 }
 0x4b1   : > { %v1258_v23 = vmin.f32 %v1256_v21, %v1257_v22 }
 0x4b3   : > { %v1259_v6 = vrot.slane %v1258_v23, 2 }
 0x4b5   : > { %v1260_v7 = vmin.f32 %v1258_v23, %v1259_v6 }
 0x4b7   : > { %v1261_v10 = vrot.slane %v1260_v7, 1 }
 0x4b9   : > { %v1262_v11 = vmin.f32 %v1260_v7, %v1261_v10 }
 0x4bb   : > { %vm1263_vm12 = vcmp.le.f32.partialorder %v1242_v0, %v1262_v11  ;;  %vm1264_vm13 = vcmp.le.f32.partialorder %v1243_v4, %v1262_v11  ;;  %vm1265_vm14 = vcmp.le.f32.partialorder %v1244_v9, %v1262_v11  ;;  %vm1266_vm15 = vcmp.le.f32.partialorder %v1245_v8, %v1262_v11  ;;  %v2151_v0 = vld [vmem:[%s3364_s1 + $0xd8] sm:$0xff] }
 0x4bc   : > { %vm1267_vm2 = vcmp.le.f32.partialorder %v1246_v52, %v1262_v11  ;;  %vm1268_vm3 = vcmp.le.f32.partialorder %v1247_v1, %v1262_v11  ;;  %vm1269_vm4 = vcmp.le.f32.partialorder %v1248_v15, %v1262_v11  ;;  %vm1270_vm5 = vcmp.le.f32.partialorder %v1249_v2, %v1262_v11  ;;  %v2149_v52 = vld [vmem:[%s3364_s1 + $0xc8] sm:$0xff]  ;;  %v2152_v1 = vld [vmem:[%s3364_s1 + $0xe0] sm:$0xff]  ;;  %v2155_v4 = vld [vmem:[%s3364_s1 + $0xf8] sm:$0xff] }
 0x4bd   : > { %v1271_v30 = vsel %vm1263_vm12, %v2932_v29, 64  ;;  %v1272_v31 = vsel %vm1264_vm13, %v2937_v40, 64  ;;  %v1273_v32 = vsel %vm1265_vm14, %v2940_v41, 64  ;;  %v1274_v36 = vsel %vm1266_vm15, %v2943_v42, 64  ;;  %1731 = vxpose.xlu1.b32.cont [2/8] (short) (narrow) %v2149_v52, 32  ;;  %v2153_v2 = vld [vmem:[%s3364_s1 + $0xe8] sm:$0xff] }
 0x4be   : > { %v1275_v33 = vsel %vm1267_vm2, %v2946_v44, 64  ;;  %v1276_v38 = vsel %vm1268_vm3, %v2949_v45, 64  ;;  %v1277_v43 = vsel %vm1269_vm4, %v2952_v46, 64  ;;  %v1278_v34 = vsel %vm1270_vm5, %v2955_v47, 64 }
 0x4bf   : > { %vm1279_vm6 = vcmp.lt.s32.totalorder %v1271_v30, %v1275_v33  ;;  %vm1281_vm7 = vcmp.lt.s32.totalorder %v1272_v31, %v1276_v38  ;;  %vm1283_vm8 = vcmp.lt.s32.totalorder %v1273_v32, %v1277_v43  ;;  %vm1285_vm9 = vcmp.lt.s32.totalorder %v1274_v36, %v1278_v34 }
 0x4c0   : > { %v1280_v48 = vsel %vm1279_vm6, %v1271_v30, %v1275_v33  ;;  %v1282_v35 = vsel %vm1281_vm7, %v1272_v31, %v1276_v38  ;;  %v1284_v49 = vsel %vm1283_vm8, %v1273_v32, %v1277_v43  ;;  %v1286_v24 = vsel %vm1285_vm9, %v1274_v36, %v1278_v34 }
 0x4c1   : > { %vm1287_vm10 = vcmp.lt.s32.totalorder %v1280_v48, %v1282_v35  ;;  %vm1289_vm11 = vcmp.lt.s32.totalorder %v1284_v49, %v1286_v24  ;;  %vm1871_vm2 = vcmask 1040384   ;;  %vm1873_vm3 = vcmask 1041408   ;;  %1732 = vxpose.xlu1.b32.cont [3/8] (short) (narrow) %v2150_v63, 32 }
 0x4c2   : > { %v1288_v26 = vsel %vm1287_vm10, %v1280_v48, %v1282_v35  ;;  %v1290_v27 = vsel %vm1289_vm11, %v1284_v49, %v1286_v24  ;;  %v1872_v39 = vsel %vm1871_vm2, %v2973_v12, %v3058_v25  ;;  %v1344_v12 = vpop.trf.xlu0 }
 0x4c3   : > { %vm1291_vm12 = vcmp.lt.s32.totalorder %v1288_v26, %v1290_v27 }
 0x4c4   : > { %v1292_v28 = vsel %vm1291_vm12, %v1288_v26, %v1290_v27 }
 0x4c5   : > { %v1293_v54 = vrot.slane %v1292_v28, 4  ;;  %1733 = vxpose.xlu1.b32.cont [4/8] (short) (narrow) %v2151_v0, 32 }
 0x4c6   : > { %v1345_v25 = vpop.trf.xlu0 }
 0x4c7   : > { %vm1294_vm13 = vcmp.lt.s32.totalorder %v1292_v28, %v1293_v54 }
 0x4c8   : > { %v1295_v55 = vsel %vm1294_vm13, %v1292_v28, %v1293_v54 }
 0x4c9   : > { %v1296_v56 = vrot.slane %v1295_v55, 2  ;;  %1734 = vxpose.xlu1.b32.cont [5/8] (short) (narrow) %v2152_v1, 32 }
 0x4cb   : > { %vm1297_vm14 = vcmp.lt.s32.totalorder %v1295_v55, %v1296_v56 }
 0x4cc   : > { %v1298_v57 = vsel %vm1297_vm14, %v1295_v55, %v1296_v56 }
 0x4cd   : > { %v1299_v58 = vrot.slane %v1298_v57, 1  ;;  %1735 = vxpose.xlu1.b32.cont [6/8] (short) (narrow) %v2153_v2, 32 }
 0x4cf   : > { %vm1300_vm15 = vcmp.lt.s32.totalorder %v1298_v57, %v1299_v58 }
 0x4d0   : > { %v1301_v59 = vsel %vm1300_vm15, %v1298_v57, %v1299_v58 }
 0x4d1   : > { %vm1309_vm4 = vcmp.eq.s32.totalorder %v2955_v47, %v1301_v59  ;;  %vm1308_vm5 = vcmp.eq.s32.totalorder %v2952_v46, %v1301_v59  ;;  %v3162_v60 = vsel %vm1873_vm3, %v1872_v39, %v1301_v59  ;;  %vm1307_vm6 = vcmp.eq.s32.totalorder %v2949_v45, %v1301_v59  ;;  %1736 = vxpose.xlu1.b32.cont [7/8] (short) (narrow) %v2154_v3, 32 }
 0x4d2   : > { %2401 = vmatprep.subr.msk.mxu1 %vm1309_vm4, %v2645_v13  ;;  %vm1306_vm7 = vcmp.eq.s32.totalorder %v2946_v44, %v1301_v59  ;;  %vm1305_vm8 = vcmp.eq.s32.totalorder %v2943_v42, %v1301_v59  ;;  %vm1304_vm9 = vcmp.eq.s32.totalorder %v2940_v41, %v1301_v59  ;;  %vm1303_vm10 = vcmp.eq.s32.totalorder %v2937_v40, %v1301_v59 }
 0x4d3   : > { %2402 = vmatpush3.msk.msra.mxu1 %vm1309_vm4, %v2645_v13  ;;  %vm1302_vm11 = vcmp.eq.s32.totalorder %v2932_v29, %v1301_v59 }
 0x4d4   : > { %2403 = vmatprep.subr.msk.mxu1 %vm1308_vm5, %v2645_v13 }
 0x4d5   : > { %2404 = vmatpush3.msk.msra.mxu1 %vm1308_vm5, %v2645_v13  ;;  %1737 = vxpose.xlu1.b32.end [8/8] (short) (narrow) %v2155_v4, 32 }
 0x4d6   : > { %2405 = vmatprep.subr.msk.mxu1 %vm1307_vm6, %v2645_v13 }
 0x4d7   : > { %2406 = vmatpush3.msk.msra.mxu1 %vm1307_vm6, %v2645_v13 }
 0x4d8   : > { %2407 = vmatprep.subr.msk.mxu1 %vm1306_vm7, %v2645_v13 }
 0x4d9   : > { %2408 = vmatpush3.msk.msra.mxu1 %vm1306_vm7, %v2645_v13 }
 0x4da   : > { %2409 = vmatprep.subr.msk.mxu1 %vm1305_vm8, %v2645_v13 }
 0x4db   : > { %2410 = vmatpush3.msk.msra.mxu1 %vm1305_vm8, %v2645_v13 }
 0x4dc   : > { %2411 = vmatprep.subr.msk.mxu1 %vm1304_vm9, %v2645_v13 }
 0x4dd   : > { %2412 = vmatpush3.msk.msra.mxu1 %vm1304_vm9, %v2645_v13 }
 0x4de   : > { %2413 = vmatprep.subr.msk.mxu1 %vm1303_vm10, %v2645_v13 }
 0x4df   : > { %2414 = vmatpush3.msk.msra.mxu1 %vm1303_vm10, %v2645_v13 }
 0x4e0   : > { %2415 = vmatprep.subr.msk.mxu1 %vm1302_vm11, %v2645_v13 }
 0x4e1   : > { %2416 = vmatpush3.msk.msra.mxu1 %vm1302_vm11, %v2645_v13 }
 0x4e2   : > { %2418 = vmatmul.mubr.msk.f32.vlgmr.msra.gmra.mxu1 %vm549_vm1, %v1343_v61 }
 0x4e3   : > { %2420 = vmatprep.mubr.msk.f32.mxu1 %vm549_vm1, %v1344_v12 }
 0x4e6   : > { %2421 = vmatmul.mubr.msk.f32.gmra.mxu1 %vm549_vm1, %v1345_v25 }
 0x5a2   : > { %v2419_v5 = vpop.f32.mrf.mxu1 }
 0x5a3   : > { %v3221_v17 = vsub.f32 %v3129_v51, %v2419_v5 }
 0x5a4   : > { %v1436_v8 = vpop.f32.mrf.mxu1 }
 0x5a5   : > { %v3226_v18 = vsub.f32 %v3134_v53, %v1436_v8 }
 0x5a6   : > { %v2422_v9 = vpop.f32.mrf.mxu1 }
 0x5a7   : > { %v3213_v14 = vsub.f32 %v3121_v37, %v2422_v9  ;;  %v1609_v37 = vpop.permute.xlu1 %1608 }
 0x5a8   : > { %v1446_v15 = vpop.f32.mrf.mxu1 }
 0x5a9   : > { %v3216_v16 = vsub.f32 %v3124_v50, %v1446_v15  ;;  %2423 = vmatprep.subr.mxu0 %v3213_v14 }
 0x5aa   : > { %2424 = vmatpush3.msra.mxu0 %v3213_v14 }
 0x5ab   : > { %2425 = vmatprep.subr.mxu0 %v3216_v16  ;;  %v1614_v50 = vpop.permute.xlu1 %1613 }
 0x5ac   : > { %2426 = vmatpush3.msra.mxu0 %v3216_v16 }
 0x5ad   : > { %2427 = vmatprep.subr.mxu0 %v3221_v17 }
 0x5ae   : > { %2428 = vmatpush3.msra.mxu0 %v3221_v17 }
 0x5af   : > { %2429 = vmatprep.subr.mxu0 %v3226_v18  ;;  %v1619_v51 = vpop.permute.xlu1 %1618 }
 0x5b0   : > { %2430 = vmatpush3.msra.mxu0 %v3226_v18 }
 0x5b1   : > { %2432 = vmatmul.mubr.msk.f32.vlgmr.msra.gmra.mxu0 %vm263_vm0, %v2149_v52 }
 0x5b2   : > { %2434 = vmatprep.mubr.msk.f32.mxu0 %vm263_vm0, %v2150_v63 }
 0x5b3   : > { %v1624_v53 = vpop.permute.xlu1 %1623 }
 0x5b5   : > { %2435 = vmatmul.mubr.msk.f32.gmra.mxu0 %vm263_vm0, %v2151_v0 }
 0x5b6   : > { %2437 = vmatprep.mubr.msk.f32.mxu0 %vm263_vm0, %v2152_v1 }
 0x5b7   : > { %v1629_v19 = vpop.permute.xlu1 %1628 }
 0x5b9   : > { %2438 = vmatmul.mubr.msk.f32.gmra.mxu0 %vm263_vm0, %v2153_v2 }
 0x5ba   : > { %2440 = vmatprep.mubr.msk.f32.mxu0 %vm263_vm0, %v2154_v3 }
 0x5bb   : > { %v1634_v20 = vpop.permute.xlu1 %1633 }
 0x5bd   : > { %2441 = vmatmul.mubr.msk.f32.gmra.mxu0 %vm263_vm0, %v2155_v4 }
 0x5bf   : > { %v1639_v21 = vpop.permute.xlu1 %1638 }
 0x5c3   : > { %v1644_v22 = vpop.permute.xlu1 %1643 }
 0x5c7   : > { %v1746_v23 = vpop.trf.xlu1 }
 0x5c8   : > { %2459 = vmatprep.mubr.msk.f32.mxu1 %vm549_vm1, %v1746_v23 }
 0x671   : > { %v2433_v6 = vpop.f32.mrf.mxu0 }
 0x672   : > { %v1647_v34 = vsub.f32 %v1614_v50, %v2433_v6 }
 0x673   : > { %v1567_v7 = vpop.f32.mrf.mxu0 }
 0x674   : > { %v1646_v33 = vsub.f32 %v1609_v37, %v1567_v7 }
 0x675   : > { %v2436_v10 = vpop.f32.mrf.mxu0 }
 0x676   : > { %v1649_v35 = vsub.f32 %v1624_v53, %v2436_v10 }
 0x677   : > { %v1577_v11 = vpop.f32.mrf.mxu0 }
 0x678   : > { %v1648_v49 = vsub.f32 %v1619_v51, %v1577_v11 }
 0x679   : > { %v2439_v30 = vpop.f32.mrf.mxu0 }
 0x67a   : > { %v1651_v38 = vsub.f32 %v1634_v20, %v2439_v30 }
 0x67b   : > { %v1587_v31 = vpop.f32.mrf.mxu0 }
 0x67c   : > { %v1650_v32 = vsub.f32 %v1629_v19, %v1587_v31  ;;  %v1655_v27 = vmin.f32 %v1647_v34, %v1651_v38 }
 0x67d   : > { %v2442_v36 = vpop.f32.mrf.mxu0 }
 0x67e   : > { %v1653_v43 = vsub.f32 %v1644_v22, %v2442_v36  ;;  %v1654_v24 = vmin.f32 %v1646_v33, %v1650_v32 }
 0x67f   : > { %v1597_v48 = vpop.f32.mrf.mxu0 }
 0x680   : > { %v1652_v26 = vsub.f32 %v1639_v21, %v1597_v48  ;;  %v1657_v28 = vmin.f32 %v1649_v35, %v1653_v43  ;;  %v1658_v55 = vmin.f32 %v1654_v24, %v1655_v27 }
 0x682   : > { %v1656_v54 = vmin.f32 %v1648_v49, %v1652_v26 }
 0x684   : > { %v1659_v56 = vmin.f32 %v1656_v54, %v1657_v28 }
 0x686   : > { %v1660_v57 = vmin.f32 %v1658_v55, %v1659_v56 }
 0x688   : > { %v1661_v58 = vrot.slane %v1660_v57, 4 }
 0x68a   : > { %v1662_v59 = vmin.f32 %v1660_v57, %v1661_v58 }
 0x68c   : > { %v1663_v39 = vrot.slane %v1662_v59, 2 }
 0x68e   : > { %v1664_v61 = vmin.f32 %v1662_v59, %v1663_v39 }
 0x690   : > { %v1665_v12 = vrot.slane %v1664_v61, 1 }
 0x692   : > { %v1666_v25 = vmin.f32 %v1664_v61, %v1665_v12 }
 0x694   : > { %vm1667_vm0 = vcmp.le.f32.partialorder %v1646_v33, %v1666_v25  ;;  %vm1668_vm12 = vcmp.le.f32.partialorder %v1647_v34, %v1666_v25  ;;  %vm1669_vm13 = vcmp.le.f32.partialorder %v1648_v49, %v1666_v25  ;;  %vm1670_vm14 = vcmp.le.f32.partialorder %v1649_v35, %v1666_v25 }
 0x695   : > { %vm1671_vm15 = vcmp.le.f32.partialorder %v1650_v32, %v1666_v25  ;;  %vm1672_vm2 = vcmp.le.f32.partialorder %v1651_v38, %v1666_v25  ;;  %vm1673_vm3 = vcmp.le.f32.partialorder %v1652_v26, %v1666_v25  ;;  %vm1674_vm4 = vcmp.le.f32.partialorder %v1653_v43, %v1666_v25 }
 0x696   : > { %v1675_v62 = vsel %vm1667_vm0, %v2932_v29, 64  ;;  %v1676_v52 = vsel %vm1668_vm12, %v2937_v40, 64  ;;  %v1677_v63 = vsel %vm1669_vm13, %v2940_v41, 64  ;;  %v1678_v0 = vsel %vm1670_vm14, %v2943_v42, 64 }
 0x697   : > { %v1679_v1 = vsel %vm1671_vm15, %v2946_v44, 64  ;;  %v1680_v2 = vsel %vm1672_vm2, %v2949_v45, 64  ;;  %v1681_v3 = vsel %vm1673_vm3, %v2952_v46, 64  ;;  %v1682_v4 = vsel %vm1674_vm4, %v2955_v47, 64 }
 0x698   : > { %vm1683_vm5 = vcmp.lt.s32.totalorder %v1675_v62, %v1679_v1  ;;  %vm1685_vm6 = vcmp.lt.s32.totalorder %v1676_v52, %v1680_v2  ;;  %vm1687_vm7 = vcmp.lt.s32.totalorder %v1677_v63, %v1681_v3  ;;  %vm1689_vm8 = vcmp.lt.s32.totalorder %v1678_v0, %v1682_v4 }
 0x699   : > { %v1684_v5 = vsel %vm1683_vm5, %v1675_v62, %v1679_v1  ;;  %v1686_v8 = vsel %vm1685_vm6, %v1676_v52, %v1680_v2  ;;  %v1688_v9 = vsel %vm1687_vm7, %v1677_v63, %v1681_v3  ;;  %v1690_v15 = vsel %vm1689_vm8, %v1678_v0, %v1682_v4 }
 0x69a   : > { %vm1691_vm9 = vcmp.lt.s32.totalorder %v1684_v5, %v1686_v8  ;;  %vm1693_vm10 = vcmp.lt.s32.totalorder %v1688_v9, %v1690_v15  ;;  %vm1875_vm14 = vcmask 1042432  }
 0x69b   : > { %v1692_v37 = vsel %vm1691_vm9, %v1684_v5, %v1686_v8  ;;  %v1694_v50 = vsel %vm1693_vm10, %v1688_v9, %v1690_v15 }
 0x69c   : > { %vm1695_vm11 = vcmp.lt.s32.totalorder %v1692_v37, %v1694_v50 }
 0x69d   : > { %v1696_v51 = vsel %vm1695_vm11, %v1692_v37, %v1694_v50 }
 0x69e   : > { %v1697_v53 = vrot.slane %v1696_v51, 4 }
 0x6a0   : > { %vm1698_vm0 = vcmp.lt.s32.totalorder %v1696_v51, %v1697_v53 }
 0x6a1   : > { %v1699_v19 = vsel %vm1698_vm0, %v1696_v51, %v1697_v53 }
 0x6a2   : > { %v1700_v20 = vrot.slane %v1699_v19, 2 }
 0x6a4   : > { %vm1701_vm12 = vcmp.lt.s32.totalorder %v1699_v19, %v1700_v20 }
 0x6a5   : > { %v1702_v21 = vsel %vm1701_vm12, %v1699_v19, %v1700_v20 }
 0x6a6   : > { %v1703_v22 = vrot.slane %v1702_v21, 1 }
 0x6a8   : > { %vm1704_vm13 = vcmp.lt.s32.totalorder %v1702_v21, %v1703_v22 }
 0x6a9   : > { %v1705_v23 = vsel %vm1704_vm13, %v1702_v21, %v1703_v22 }
 0x6aa   : > { %vm1713_vm15 = vcmp.eq.s32.totalorder %v2955_v47, %v1705_v23  ;;  %vm1712_vm2 = vcmp.eq.s32.totalorder %v2952_v46, %v1705_v23  ;;  %v1876_v6 = vsel %vm1875_vm14, %v3162_v60, %v1705_v23  ;;  %vm1711_vm3 = vcmp.eq.s32.totalorder %v2949_v45, %v1705_v23  ;;  %v1747_v47 = vpop.trf.xlu1 }
 0x6ab   : > { %2443 = vmatprep.subr.msk.mxu1 %vm1713_vm15, %v2645_v13  ;;  %1877 = vst [vmem:[%s3258_s26] sm:$0xf] %v1876_v6  ;;  %vm1710_vm4 = vcmp.eq.s32.totalorder %v2946_v44, %v1705_v23  ;;  %vm1709_vm5 = vcmp.eq.s32.totalorder %v2943_v42, %v1705_v23  ;;  %vm1708_vm6 = vcmp.eq.s32.totalorder %v2940_v41, %v1705_v23 }
 0x6ac   : > { %2444 = vmatpush3.msk.msra.mxu1 %vm1713_vm15, %v2645_v13  ;;  %vm1707_vm7 = vcmp.eq.s32.totalorder %v2937_v40, %v1705_v23  ;;  %vm1706_vm8 = vcmp.eq.s32.totalorder %v2932_v29, %v1705_v23 }
 0x6ad   : > { %2445 = vmatprep.subr.msk.mxu1 %vm1712_vm2, %v2645_v13 }
 0x6ae   : > { %2446 = vmatpush3.msk.msra.mxu1 %vm1712_vm2, %v2645_v13  ;;  %v1748_v44 = vpop.trf.xlu1 }
 0x6af   : > { %2447 = vmatprep.subr.msk.mxu1 %vm1711_vm3, %v2645_v13 }
 0x6b0   : > { %2448 = vmatpush3.msk.msra.mxu1 %vm1711_vm3, %v2645_v13 }
 0x6b1   : > { %2449 = vmatprep.subr.msk.mxu1 %vm1710_vm4, %v2645_v13 }
 0x6b2   : > { %2450 = vmatpush3.msk.msra.mxu1 %vm1710_vm4, %v2645_v13  ;;  %v1749_v41 = vpop.trf.xlu1 }
 0x6b3   : > { %2451 = vmatprep.subr.msk.mxu1 %vm1709_vm5, %v2645_v13 }
 0x6b4   : > { %2452 = vmatpush3.msk.msra.mxu1 %vm1709_vm5, %v2645_v13 }
 0x6b5   : > { %2453 = vmatprep.subr.msk.mxu1 %vm1708_vm6, %v2645_v13 }
 0x6b6   : > { %2454 = vmatpush3.msk.msra.mxu1 %vm1708_vm6, %v2645_v13 }
 0x6b7   : > { %2455 = vmatprep.subr.msk.mxu1 %vm1707_vm7, %v2645_v13 }
 0x6b8   : > { %2456 = vmatpush3.msk.msra.mxu1 %vm1707_vm7, %v2645_v13 }
 0x6b9   : > { %2457 = vmatprep.subr.msk.mxu1 %vm1706_vm8, %v2645_v13 }
 0x6ba   : > { %2458 = vmatpush3.msk.msra.mxu1 %vm1706_vm8, %v2645_v13 }
 0x6bb   : > { %2460 = vmatmul.mubr.msk.f32.vlgmr.msra.gmra.mxu1 %vm549_vm1, %v1747_v47 }
 0x6bc   : > { %2462 = vmatprep.mubr.msk.f32.mxu1 %vm549_vm1, %v1748_v44 }
 0x6bf   : > { %2463 = vmatmul.mubr.msk.f32.gmra.mxu1 %vm549_vm1, %v1749_v41 }
 0x6c0   : > { %2549 = shalt.err (!%p2546_p5)
}
 0x6c1   : > { %s2550_s13 = scalar_lea.hbm %s1913_s6, 64  ;;  %s2554_s26 = scalar_lea.hbm %s3367_s4, 128 }
 0x6c2   : > { %p2551_p6 = scmp.ne.s32.totalorder %s1913_s6, %s2550_s13  ;;  %p2555_p10 = scmp.lt.s32.totalorder %s1913_s6, %s3367_s4 }
 0x6c3   : > { %p2556_p11 = scmp.lt.s32.totalorder %s2554_s26, %s2550_s13 }
 0x6c4   : > { %p2552_p7 = pnand %p2551_p6, %p2715_p4 }
 0x6c5   : > { %p2557_p12 = por %p2556_p11, %p2555_p10 }
 0x6c6   : > { %p2553_p9 = pneg %p2552_p7 }
 0x6c8   : > { %p2558_p13 = pnand %p2557_p12, %p2553_p9 }
 0x6ca   : > { %2561 = shalt.err (!%p2558_p13)
}
 0x6cb   : > { %2466 = dma.vmem_to_hbm [thread:$0]  (%p2715_p4), %s1916_s7, 64, %s1913_s6, %s1884_s8   ;;  %v2532_v45 = vld [vmem:[%s2751_s24 + $0x8] sm:$0xff]  ;;  %v2533_v7 = vld [vmem:[%s2751_s24] sm:$0xff] }
 0x6cc   : > { %s2028_s5 = sshll.u32 %s3249_s21, 5  ;;  %s2200_s6 = sshll.u32 %s2634_s18, 9 }
 0x6cd   : > { %s218_s9 = scalar_lea.vmem [#allocation2], %s2028_s5  ;;  %s3316_s11 = scalar_lea.hbm %s3366_s3, %s2200_s6 }
 0x6ce   : > { %s1898_s10 = sshll.u32 %s218_s9, 4  ;;  %s1879_s18 = scalar_lea.sflag [#allocation3], %s3249_s21  ;;  %s3310_s10 = int_to_ptr.vmem [resolvable:$true] %s1898_s10 }
 0x6cf   : > { %s2562_s12 = scalar_lea.vmem %s3310_s10, 512  ;;  %s2647_s13 = smov [#allocation2]  }
 0x6d0   : > { %p2563_p0 = scmp.ne.s32.totalorder %s3310_s10, %s2562_s12  ;;  %s2566_s14 = sshll.u32 %s2647_s13, 4  ;;  %s2567_s14 = int_to_ptr.vmem [resolvable:$false] %s2566_s14 }
 0x6d1   : > { %s2568_s22 = scalar_lea.vmem %s2567_s14, 1024  ;;  %p2569_p3 = scmp.lt.s32.totalorder %s3310_s10, %s2567_s14 }
 0x6d2   : > { %p2564_p1 = pnand %p2563_p0, %p2715_p4  ;;  %p2570_p5 = scmp.lt.s32.totalorder %s2568_s22, %s2562_s12 }
 0x6d4   : > { %p2565_p2 = pneg %p2564_p1  ;;  %p2571_p6 = por %p2570_p5, %p2569_p3 }
 0x6d6   : > { %p2572_p7 = pnand %p2571_p6, %p2565_p2 }
 0x77b   : > { %v2461_v29 = vpop.f32.mrf.mxu1 }
 0x77c   : > { %v1860_v40 = vsub.f32 %v3221_v17, %v2461_v29  ;;  %v2534_v17 = vld [vmem:[%s2751_s24 + $0x18] sm:$0xff] }
 0x77d   : > { %v1840_v42 = vpop.f32.mrf.mxu1 }
 0x77e   : > { %v1864_v46 = vsub.f32 %v2532_v45, %v1860_v40  ;;  %v1859_v13 = vsub.f32 %v3226_v18, %v1840_v42  ;;  %v2535_v18 = vld [vmem:[%s2751_s24 + $0x10] sm:$0xff] }
 0x77f   : > { %v2464_v60 = vpop.f32.mrf.mxu1 }
 0x780   : > { %1868 = vst [vmem:[%s218_s9 + $0x8] sm:$0xff] %v1864_v46  ;;  %v1863_v10 = vsub.f32 %v2533_v7, %v1859_v13  ;;  %v1862_v11 = vsub.f32 %v3213_v14, %v2464_v60 }
 0x781   : > { %v1850_v30 = vpop.f32.mrf.mxu1 }
 0x782   : > { %1867 = vst [vmem:[%s218_s9] sm:$0xff] %v1863_v10  ;;  %v1866_v31 = vsub.f32 %v2534_v17, %v1862_v11  ;;  %v1861_v32 = vsub.f32 %v3216_v16, %v1850_v30 }
 0x784   : > { %1870 = vst [vmem:[%s218_s9 + $0x18] sm:$0xff] %v1866_v31  ;;  %v1865_v36 = vsub.f32 %v2535_v18, %v1861_v32 }
 0x786   : > { %1869 = vst [vmem:[%s218_s9 + $0x10] sm:$0xff] %v1865_v36 }
 0x787   : > { %2575 = shalt.err (!%p2572_p7)
}
 0x788   : > { %s2576_s24 = scalar_lea.hbm %s3316_s11, 512  ;;  %s2580_s30 = scalar_lea.hbm %s3366_s3, 1024 }
 0x789   : > { %p2577_p9 = scmp.ne.s32.totalorder %s3316_s11, %s2576_s24  ;;  %p2581_p12 = scmp.lt.s32.totalorder %s3316_s11, %s3366_s3 }
 0x78a   : > { %p2582_p13 = scmp.lt.s32.totalorder %s2580_s30, %s2576_s24 }
 0x78b   : > { %p2578_p10 = pnand %p2577_p9, %p2715_p4 }
 0x78c   : > { %p2583_p0 = por %p2582_p13, %p2581_p12 }
 0x78d   : > { %p2579_p11 = pneg %p2578_p10 }
 0x78f   : > { %p2584_p1 = pnand %p2583_p0, %p2579_p11 }
 0x791   : > { %2587 = shalt.err (!%p2584_p1)
}
 0x792   : > { %s2648_s6 = smov 128   ;;  %s2649_s7 = smov 8  }
 0x793   : > { %2465 = dma.vmem_to_hbm [thread:$0]  (%p2715_p4), %s3310_s10, 512, %s3316_s11, %s1879_s18, %s2648_s6, %s2648_s6, %s2649_s7  }
 0x794 PF: > { %p2476_p2 = scmp.ge.s32.totalorder %s2642_s20, 2  ;;  %s1927_s8 = sand.u32 1, %s2622_s15  }
 0x795   : > { %s1928_s12 = scalar_lea.sflag [#allocation3], %s1927_s8 }
 0x796   : > { %p2470_p3 = pnand %p2476_p2, %p2722_p8 }
 0x798   : > { %p2471_p5 = pneg %p2470_p3 }
 0x79a   : > { %2613 = dma.done.wait (%p2471_p5), %s1928_s12, 512  }
 0x79b   : > { %2615 = vsyncadd (%p2471_p5), %s1928_s12, 4294966784  ;;  %s1937_s13 = scalar_lea.sflag [#allocation5], %s1927_s8 }
 0x79c   : > { %2617 = dma.done.wait (%p2471_p5), %s1937_s13, 64  }
 0x79d   : > { %2619 = vsyncadd (%p2471_p5), %s1937_s13, 4294967232  ;;  %s21_s20 = sadd.s32 1, %s2642_s20   ;;  %s3370_s15 = smov %s2626_s16 }
 0x79e   : > { %p18_p6 = scmp.ge.s32.totalorder %s21_s20, 4   ;;  %s3371_s16 = smov %s2630_s17 }
 0x79f   : > { %s3372_s17 = smov %s2728_s28  ;;  %s3373_s18 = smov %s2638_s19 }
 0x7a0   : > { %s3374_s19 = smov %s3376_s23  ;;  %20 = sbr.rel (!%p18_p6) target bundleno = 6 (0x6), region = 90 }
 0x7a5   :  { %1942 = vsyncpa [#allocation3], 1 }
 0x7a6   :  { %1944 = vsyncpa [#allocation3 + $0x1], 1 }
 0x7a7   :  { %1945 = vsyncpa [#allocation5], 1 }
 0x7a8   :  { %1947 = vsyncpa [#allocation5 + $0x1], 1 }

</bundles_post_ra>
